<compile_context>
chip_gen: v6e
topology: v6e:2x2x1
jax: 0.10.0
libtpu: 0.0.40
codegen_flags: <defaults>
</compile_context>

<pallas_src>
import functools

import numpy as np
import jax
import jax.numpy as jnp
from jax.experimental import pallas as pl
from jax.experimental.pallas import tpu as pltpu


def _round_up(n: int, m: int) -> int:
    return ((n + m - 1) // m) * m


def _derived_vmem_limit() -> int:
    """Generation-aware VMEM limit: ~75% of physical, >=32 MiB fallback."""
    try:
        cap = int(pltpu.get_tpu_info().vmem_capacity_bytes)
    except Exception:  # interpret mode / older API: use a safe default
        cap = 64 << 20
    return max(32 << 20, (cap * 3) // 4)


def _bilinear_kernel(big_ref, small_ref, u2_ref, s_ref, wb_ref, ws_ref, bias_ref,
                     out_ref, *, out_tile):
    """One (batch tile, output tile) grid point.

    big_ref   : (TB, Dbig)            activations on the contracted (max) side
    small_ref : (TB, Dsmall=inner)    activations on the replicated (min) side
    u2_ref    : (Dbig, out_tile*inner)  U2[p, o_local*inner + q]
    s_ref     : (out_tile*inner, out_tile) block-diagonal ones (group-sum over q)
    wb_ref    : (Dbig, out_tile)      W_big^T column tile
    ws_ref    : (Dsmall, out_tile)    W_small^T column tile
    bias_ref  : (1, out_tile)         f32 bias tile
    out_ref   : (TB, out_tile)        lane-dense output tile
    """
    cdt = u2_ref.dtype                       # MXU operand dtype (f32 or bf16)
    big_c = big_ref[...].astype(cdt)         # cast once, reuse for both MXU uses
    small = small_ref[...]
    small_c = small.astype(cdt)

    # Bilinear term: tmp[b, o*inner + q] = sum_p big[b,p] * U2[p, o*inner + q]
    tmp = jnp.dot(big_c, u2_ref[...], preferred_element_type=jnp.float32)
    # Replicate the small side across the out_tile groups (VPU/XLU filler that
    # co-issues with the MXU): st[b, o*inner + q] = small[b, q]
    st = jnp.tile(small.astype(jnp.float32), (1, out_tile))
    prod = tmp * st
    # Group-sum over q via block-diagonal ones matrix (MXU). See header comment.
    bil = jnp.dot(prod.astype(cdt), s_ref[...], preferred_element_type=jnp.float32)

    # Linear terms (two small MXU calls; no cross-lane slicing needed).
    lin = (jnp.dot(big_c, wb_ref[...], preferred_element_type=jnp.float32)
           + jnp.dot(small_c, ws_ref[...], preferred_element_type=jnp.float32))

    out_ref[...] = (bil + lin + bias_ref[...]).astype(out_ref.dtype)


def pack_bilinear_params(U, W_l, W_r, bias, param_dtype=jnp.float32, out_tile=128):
    """One-time parameter repacking (hoist out of the per-call path).

    Orients the bilinear so the MXU contraction runs over max(L, R) and the
    replicated side is min(L, R); pads the output dim to a multiple of out_tile.
    param_dtype=jnp.bfloat16 halves weight VMEM/DMA on v6e/v7x (f32 accumulation
    is preserved in-kernel, but the elementwise bilinear product is rounded).
    """
    O, L, R = U.shape
    assert out_tile % 128 == 0, "out_tile must be a multiple of 128 lanes"
    Opad = _round_up(max(O, out_tile), out_tile)

    if L >= R:
        inner = R
        Ut = jnp.transpose(U, (1, 0, 2))      # Ut[i, o, j] = U[o, i, j]
        W_big, W_small = W_l, W_r
    else:
        inner = L
        Ut = jnp.transpose(U, (2, 0, 1))      # Ut[j, o, i] = U[o, i, j]
        W_big, W_small = W_r, W_l
    big = max(L, R)

    U2 = Ut.reshape(big, O * inner)
    if Opad != O:                              # zero-pad the extra output groups
        U2 = jnp.pad(U2, ((0, 0), (0, (Opad - O) * inner)))
    U2 = U2.astype(param_dtype)

    # Per-O-tile group-sum matrix, shared by every output tile (constant block).
    s_np = np.zeros((out_tile * inner, out_tile), np.float32)
    s_np[np.arange(out_tile * inner), np.arange(out_tile * inner) // inner] = 1.0
    S = jnp.asarray(s_np, dtype=param_dtype)   # 0/1 values: exact even in bf16

    Wb = jnp.zeros((big, Opad), param_dtype).at[:, :O].set(W_big.T.astype(param_dtype))
    Ws = jnp.zeros((inner, Opad), param_dtype).at[:, :O].set(W_small.T.astype(param_dtype))
    bias_pad = jnp.zeros((1, Opad), jnp.float32).at[0, :O].set(bias.astype(jnp.float32))
    return U2, S, Wb, Ws, bias_pad


@functools.partial(jax.jit, static_argnames=("out_features", "block_rows"))
def bilinear_forward_packed(input_left, input_right, U2, S, Wb, Ws, bias_pad,
                            *, out_features, block_rows=256):
    """Forward with pre-packed parameters (preferred path)."""
    batch_shape = input_left.shape[:-1]
    assert batch_shape == input_right.shape[:-1], "batch dims mismatch"
    L = input_left.shape[-1]
    R = input_right.shape[-1]
    B = int(np.prod(batch_shape)) if batch_shape else 1

    # Same orientation rule as pack_bilinear_params (contract over max(L, R)).
    if L >= R:
        big_in, small_in = input_left, input_right
    else:
        big_in, small_in = input_right, input_left
    big_in = big_in.reshape(B, -1)             # contiguous metadata reshape only
    small_in = small_in.reshape(B, -1)
    Dbig, Dsmall = big_in.shape[-1], small_in.shape[-1]

    out_tile = S.shape[1]
    inner = S.shape[0] // out_tile
    assert inner == Dsmall, "packed params do not match input feature sizes"
    Opad = bias_pad.shape[1]

    # Batch tile: multiple of 8 sublanes; ragged last tile handled by cdiv + masking.
    TB = min(block_rows, _round_up(B, 8))
    grid = (pl.cdiv(B, TB), Opad // out_tile)   # (batch tiles, output-feature tiles)

    out = pl.pallas_call(
        functools.partial(_bilinear_kernel, out_tile=out_tile),
        out_shape=jax.ShapeDtypeStruct((B, Opad), jnp.float32),
        grid=grid,
        in_specs=[
            pl.BlockSpec((TB, Dbig),   lambda i, j: (i, 0)),   # big activations
            pl.BlockSpec((TB, Dsmall), lambda i, j: (i, 0)),   # small activations
            pl.BlockSpec((Dbig, out_tile * inner), lambda i, j: (0, j)),       # U2 tile
            pl.BlockSpec((out_tile * inner, out_tile), lambda i, j: (0, 0)),   # S (const)
            pl.BlockSpec((Dbig, out_tile),   lambda i, j: (0, j)),             # W_big^T
            pl.BlockSpec((Dsmall, out_tile), lambda i, j: (0, j)),             # W_small^T
            pl.BlockSpec((1, out_tile),      lambda i, j: (0, j)),             # bias
        ],
        out_specs=pl.BlockSpec((TB, out_tile), lambda i, j: (i, j)),
        compiler_params=pltpu.CompilerParams(
            dimension_semantics=("parallel", "parallel"),
            vmem_limit_bytes=_derived_vmem_limit(),
        ),
    )(big_in, small_in, U2, S, Wb, Ws, bias_pad)

    out = out[:, :out_features]                 # strip lane padding
    return out.reshape(batch_shape + (out_features,))


def bilinear_forward(input_left, input_right, U, W_l, W_r, bias,
                     param_dtype=jnp.float32, block_rows=256):
    """Convenience wrapper matching the PyTorch module signature (packs every call;
    prefer pack_bilinear_params + bilinear_forward_packed in a real model)."""
    packed = pack_bilinear_params(U, W_l, W_r, bias, param_dtype)
    return bilinear_forward_packed(input_left, input_right, *packed,
                                   out_features=U.shape[0], block_rows=block_rows)


def _xavier_uniform(key, shape, fan_in, fan_out, dtype=jnp.float32):
    bound = float(np.sqrt(6.0 / (fan_in + fan_out)))
    return jax.random.uniform(key, shape, dtype, minval=-bound, maxval=bound)


if __name__ == "__main__":
    # Module config (small, synthetic)
    left_features, right_features, out_features = 32, 32, 16
    batch_dims = (2, 8)   # inputs: (2, 8, 32) each -> flattened batch = 16

    key = jax.random.PRNGKey(0)
    k_u, k_wl, k_wr, k_l, k_r = jax.random.split(key, 5)

    # Deterministic parameter init (xavier_uniform like reset_parameters; bias = 0)
    U = _xavier_uniform(k_u, (out_features, left_features, right_features),
                        fan_in=left_features * right_features,
                        fan_out=out_features * right_features)
    W_l = _xavier_uniform(k_wl, (out_features, left_features),
                          fan_in=left_features, fan_out=out_features)
    W_r = _xavier_uniform(k_wr, (out_features, right_features),
                          fan_in=right_features, fan_out=out_features)
    bias = jnp.zeros((out_features,), jnp.float32)

    input_left = jax.random.normal(k_l, batch_dims + (left_features,), jnp.float32)
    input_right = jax.random.normal(k_r, batch_dims + (right_features,), jnp.float32)

    # Pack parameters ONCE (hoisted out of the per-call path).  Use
    # param_dtype=jnp.bfloat16 for production on v6e/v7x.
    packed = pack_bilinear_params(U, W_l, W_r, bias, param_dtype=jnp.float32)

    out = bilinear_forward_packed(input_left, input_right, *packed,
                                  out_features=out_features)
    out = jax.block_until_ready(out)

    # Pure-JAX reference for sanity
    B = int(np.prod(batch_dims))
    l2 = input_left.reshape(B, left_features)
    r2 = input_right.reshape(B, right_features)
    ref = (jnp.einsum('bi,oij,bj->bo', l2, U, r2)
           + l2 @ W_l.T + r2 @ W_r.T + bias)
    ref = ref.reshape(batch_dims + (out_features,))

    assert out.shape == batch_dims + (out_features,)
    assert jnp.allclose(out, ref, atol=1e-4, rtol=1e-4), "mismatch vs reference"

    print("KERNEL_OK")
</pallas_src>

<mosaic_0001>
module attributes {stable_mosaic.version = 11 : i64} {
  func.func @_bilinear_kernel(%arg0: i32, %arg1: i32, %arg2: memref<16x32xf32, #tpu.memory_space<vmem>>, %arg3: memref<16x32xf32, #tpu.memory_space<vmem>>, %arg4: memref<32x4096xf32, #tpu.memory_space<vmem>>, %arg5: memref<4096x128xf32, #tpu.memory_space<vmem>>, %arg6: memref<32x128xf32, #tpu.memory_space<vmem>>, %arg7: memref<32x128xf32, #tpu.memory_space<vmem>>, %arg8: memref<1x128xf32, #tpu.memory_space<vmem>>, %arg9: memref<16x128xf32, #tpu.memory_space<vmem>>) attributes {dimension_semantics = [#tpu.dimension_semantics<parallel>, #tpu.dimension_semantics<parallel>], iteration_bounds = array<i64: 1, 1>, scalar_prefetch = 0 : i64, scratch_operands = 0 : i64, tpu.core_type = #tpu.core_type<tc>, window_params = [{transform_indices = @transform_0, window_bounds = array<i64: 16, 32>}, {transform_indices = @transform_1, window_bounds = array<i64: 16, 32>}, {transform_indices = @transform_2, window_bounds = array<i64: 32, 4096>}, {pipeline_mode = #tpu.pipeline_mode<synchronous>, transform_indices = @transform_3, window_bounds = array<i64: 4096, 128>}, {transform_indices = @transform_4, window_bounds = array<i64: 32, 128>}, {transform_indices = @transform_5, window_bounds = array<i64: 32, 128>}, {transform_indices = @transform_6, window_bounds = array<i64: 1, 128>}, {transform_indices = @transform_7, window_bounds = array<i64: 16, 128>}]} {
    %c0 = arith.constant 0 : index
    %c0_0 = arith.constant 0 : index
    %0 = vector.load %arg2[%c0, %c0_0] : memref<16x32xf32, #tpu.memory_space<vmem>>, vector<16x32xf32>
    %c0_1 = arith.constant 0 : index
    %c0_2 = arith.constant 0 : index
    %1 = vector.load %arg3[%c0_1, %c0_2] : memref<16x32xf32, #tpu.memory_space<vmem>>, vector<16x32xf32>
    %c0_3 = arith.constant 0 : index
    %c0_4 = arith.constant 0 : index
    %2 = vector.load %arg4[%c0_3, %c0_4] : memref<32x4096xf32, #tpu.memory_space<vmem>>, vector<32x4096xf32>
    %cst = arith.constant dense<0.000000e+00> : vector<16x4096xf32>
    %3 = tpu.matmul %0, %2, %cst {dimension_numbers = #tpu.dot_dimension_numbers<[1], [0], [0], [1], [0, 0, 1, 1], [], []>} : vector<16x32xf32>, vector<32x4096xf32>, vector<16x4096xf32> -> vector<16x4096xf32>
    %4 = tpu.concatenate %1, %1, %1, %1, %1, %1, %1, %1, %1, %1, %1, %1, %1, %1, %1, %1, %1, %1, %1, %1, %1, %1, %1, %1, %1, %1, %1, %1, %1, %1, %1, %1, %1, %1, %1, %1, %1, %1, %1, %1, %1, %1, %1, %1, %1, %1, %1, %1, %1, %1, %1, %1, %1, %1, %1, %1, %1, %1, %1, %1, %1, %1, %1, %1, %1, %1, %1, %1, %1, %1, %1, %1, %1, %1, %1, %1, %1, %1, %1, %1, %1, %1, %1, %1, %1, %1, %1, %1, %1, %1, %1, %1, %1, %1, %1, %1, %1, %1, %1, %1, %1, %1, %1, %1, %1, %1, %1, %1, %1, %1, %1, %1, %1, %1, %1, %1, %1, %1, %1, %1, %1, %1, %1, %1, %1, %1, %1, %1 in 1 : vector<16x32xf32>, vector<16x32xf32>, vector<16x32xf32>, vector<16x32xf32>, vector<16x32xf32>, vector<16x32xf32>, vector<16x32xf32>, vector<16x32xf32>, vector<16x32xf32>, vector<16x32xf32>, vector<16x32xf32>, vector<16x32xf32>, vector<16x32xf32>, vector<16x32xf32>, vector<16x32xf32>, vector<16x32xf32>, vector<16x32xf32>, vector<16x32xf32>, vector<16x32xf32>, vector<16x32xf32>, vector<16x32xf32>, vector<16x32xf32>, vector<16x32xf32>, vector<16x32xf32>, vector<16x32xf32>, vector<16x32xf32>, vector<16x32xf32>, vector<16x32xf32>, vector<16x32xf32>, vector<16x32xf32>, vector<16x32xf32>, vector<16x32xf32>, vector<16x32xf32>, vector<16x32xf32>, vector<16x32xf32>, vector<16x32xf32>, vector<16x32xf32>, vector<16x32xf32>, vector<16x32xf32>, vector<16x32xf32>, vector<16x32xf32>, vector<16x32xf32>, vector<16x32xf32>, vector<16x32xf32>, vector<16x32xf32>, vector<16x32xf32>, vector<16x32xf32>, vector<16x32xf32>, vector<16x32xf32>, vector<16x32xf32>, vector<16x32xf32>, vector<16x32xf32>, vector<16x32xf32>, vector<16x32xf32>, vector<16x32xf32>, vector<16x32xf32>, vector<16x32xf32>, vector<16x32xf32>, vector<16x32xf32>, vector<16x32xf32>, vector<16x32xf32>, vector<16x32xf32>, vector<16x32xf32>, vector<16x32xf32>, vector<16x32xf32>, vector<16x32xf32>, vector<16x32xf32>, vector<16x32xf32>, vector<16x32xf32>, vector<16x32xf32>, vector<16x32xf32>, vector<16x32xf32>, vector<16x32xf32>, vector<16x32xf32>, vector<16x32xf32>, vector<16x32xf32>, vector<16x32xf32>, vector<16x32xf32>, vector<16x32xf32>, vector<16x32xf32>, vector<16x32xf32>, vector<16x32xf32>, vector<16x32xf32>, vector<16x32xf32>, vector<16x32xf32>, vector<16x32xf32>, vector<16x32xf32>, vector<16x32xf32>, vector<16x32xf32>, vector<16x32xf32>, vector<16x32xf32>, vector<16x32xf32>, vector<16x32xf32>, vector<16x32xf32>, vector<16x32xf32>, vector<16x32xf32>, vector<16x32xf32>, vector<16x32xf32>, vector<16x32xf32>, vector<16x32xf32>, vector<16x32xf32>, vector<16x32xf32>, vector<16x32xf32>, vector<16x32xf32>, vector<16x32xf32>, vector<16x32xf32>, vector<16x32xf32>, vector<16x32xf32>, vector<16x32xf32>, vector<16x32xf32>, vector<16x32xf32>, vector<16x32xf32>, vector<16x32xf32>, vector<16x32xf32>, vector<16x32xf32>, vector<16x32xf32>, vector<16x32xf32>, vector<16x32xf32>, vector<16x32xf32>, vector<16x32xf32>, vector<16x32xf32>, vector<16x32xf32>, vector<16x32xf32>, vector<16x32xf32>, vector<16x32xf32>, vector<16x32xf32>, vector<16x32xf32>, vector<16x32xf32> -> vector<16x4096xf32>
    %5 = arith.mulf %3, %4 : vector<16x4096xf32>
    %c0_5 = arith.constant 0 : index
    %c0_6 = arith.constant 0 : index
    %6 = vector.load %arg5[%c0_5, %c0_6] : memref<4096x128xf32, #tpu.memory_space<vmem>>, vector<4096x128xf32>
    %cst_7 = arith.constant dense<0.000000e+00> : vector<16x128xf32>
    %7 = tpu.matmul %5, %6, %cst_7 {dimension_numbers = #tpu.dot_dimension_numbers<[1], [0], [0], [1], [0, 0, 1, 1], [], []>} : vector<16x4096xf32>, vector<4096x128xf32>, vector<16x128xf32> -> vector<16x128xf32>
    %c0_8 = arith.constant 0 : index
    %c0_9 = arith.constant 0 : index
    %8 = vector.load %arg6[%c0_8, %c0_9] : memref<32x128xf32, #tpu.memory_space<vmem>>, vector<32x128xf32>
    %cst_10 = arith.constant dense<0.000000e+00> : vector<16x128xf32>
    %9 = tpu.matmul %0, %8, %cst_10 {dimension_numbers = #tpu.dot_dimension_numbers<[1], [0], [0], [1], [0, 0, 1, 1], [], []>} : vector<16x32xf32>, vector<32x128xf32>, vector<16x128xf32> -> vector<16x128xf32>
    %c0_11 = arith.constant 0 : index
    %c0_12 = arith.constant 0 : index
    %10 = vector.load %arg7[%c0_11, %c0_12] : memref<32x128xf32, #tpu.memory_space<vmem>>, vector<32x128xf32>
    %cst_13 = arith.constant dense<0.000000e+00> : vector<16x128xf32>
    %11 = tpu.matmul %1, %10, %cst_13 {dimension_numbers = #tpu.dot_dimension_numbers<[1], [0], [0], [1], [0, 0, 1, 1], [], []>} : vector<16x32xf32>, vector<32x128xf32>, vector<16x128xf32> -> vector<16x128xf32>
    %12 = arith.addf %9, %11 : vector<16x128xf32>
    %13 = arith.addf %7, %12 : vector<16x128xf32>
    %c0_14 = arith.constant 0 : index
    %c0_15 = arith.constant 0 : index
    %14 = vector.load %arg8[%c0_14, %c0_15] : memref<1x128xf32, #tpu.memory_space<vmem>>, vector<1x128xf32>
    %15 = vector.broadcast %14 : vector<1x128xf32> to vector<16x128xf32>
    %16 = arith.addf %13, %15 : vector<16x128xf32>
    %c0_16 = arith.constant 0 : index
    %c0_17 = arith.constant 0 : index
    %17 = vector.load %arg9[%c0_16, %c0_17] : memref<16x128xf32, #tpu.memory_space<vmem>>, vector<16x128xf32>
    tpu.vector_store %arg9[%c0_16, %c0_17], %16 {strides = array<i32>} : memref<16x128xf32, #tpu.memory_space<vmem>>, vector<16x128xf32>,
    return
  }
  func.func @transform_0(%arg0: i32, %arg1: i32) -> (i32, i32) {
    %c0_i32 = arith.constant 0 : i32
    %c0_i32_0 = arith.constant 0 : i32
    return %arg0, %c0_i32 : i32, i32
  }
  func.func @transform_1(%arg0: i32, %arg1: i32) -> (i32, i32) {
    %c0_i32 = arith.constant 0 : i32
    %c0_i32_0 = arith.constant 0 : i32
    return %arg0, %c0_i32 : i32, i32
  }
  func.func @transform_2(%arg0: i32, %arg1: i32) -> (i32, i32) {
    %c0_i32 = arith.constant 0 : i32
    %c0_i32_0 = arith.constant 0 : i32
    return %c0_i32, %arg1 : i32, i32
  }
  func.func @transform_3(%arg0: i32, %arg1: i32) -> (i32, i32) {
    %c0_i32 = arith.constant 0 : i32
    %c0_i32_0 = arith.constant 0 : i32
    %c0_i32_1 = arith.constant 0 : i32
    return %c0_i32, %c0_i32_0 : i32, i32
  }
  func.func @transform_4(%arg0: i32, %arg1: i32) -> (i32, i32) {
    %c0_i32 = arith.constant 0 : i32
    %c0_i32_0 = arith.constant 0 : i32
    return %c0_i32, %arg1 : i32, i32
  }
  func.func @transform_5(%arg0: i32, %arg1: i32) -> (i32, i32) {
    %c0_i32 = arith.constant 0 : i32
    %c0_i32_0 = arith.constant 0 : i32
    return %c0_i32, %arg1 : i32, i32
  }
  func.func @transform_6(%arg0: i32, %arg1: i32) -> (i32, i32) {
    %c0_i32 = arith.constant 0 : i32
    %c0_i32_0 = arith.constant 0 : i32
    return %c0_i32, %arg1 : i32, i32
  }
  func.func @transform_7(%arg0: i32, %arg1: i32) -> (i32, i32) {
    %c0_i32 = arith.constant 0 : i32
    return %arg0, %arg1 : i32, i32
  }
}

</mosaic_0001>

<bundles_post_ra>
// kernel: bilinear_forward_packed.1
= control target key start
LH: loop header
LB: loop body
LE: loop exit
PB: predicated region body
PF: predicated region fallthrough
CT: control target
= control target key end

     0   :  { %12 = vsyncpa [#allocation3], 0  ;;  %s4650_s0 = inlined_call_operand.hbm [shape: f32[16,32], index: 0, kind: input, shape index: {}]   ;;  %s4651_s1 = inlined_call_operand.hbm [shape: f32[16,32], index: 1, kind: input, shape index: {}]   ;;  %s4652_s2 = inlined_call_operand.hbm [shape: f32[32,4096], index: 2, kind: input, shape index: {}]   ;;  %s4653_s3 = inlined_call_operand.hbm [shape: f32[4096,128], index: 3, kind: input, shape index: {}]   ;;  %s4654_s4 = inlined_call_operand.hbm [shape: f32[32,128], index: 4, kind: input, shape index: {}]   ;;  %s4655_s5 = inlined_call_operand.hbm [shape: f32[32,128], index: 5, kind: input, shape index: {}]   ;;  %s4656_s6 = inlined_call_operand.hbm [shape: f32[1,128], index: 6, kind: input, shape index: {}]   ;;  %s4657_s7 = inlined_call_operand.vmem [shape: f32[16,128], index: 7, kind: output, shape index: {}]  }
   0x1   :  { %13 = vsyncpa [#allocation5], 0 }
   0x2   :  { %14 = vsyncpa [#allocation8], 0 }
   0x3   :  { %15 = vsyncpa [#allocation11], 0  ;;  %s4317_s24 = smov [#allocation4]   ;;  %s4318_s26 = smov [#allocation7]  }
   0x4   :  { %s33_s25 = sshll.u32 %s4317_s24, 4  ;;  %s57_s27 = sshll.u32 %s4318_s26, 4  ;;  %s34_s25 = int_to_ptr.vmem [resolvable:$true] %s33_s25  ;;  %s58_s27 = int_to_ptr.vmem [resolvable:$true] %s57_s27 }
   0x5   :  { %s4177_s28 = scalar_lea.vmem %s34_s25, 256  ;;  %p4182_p1 = scmp.lt.s32.totalorder %s34_s25, %s34_s25 }
   0x6   :  { %p4178_p0 = scmp.ne.s32.totalorder %s34_s25, %s4177_s28  ;;  %p4183_p2 = scmp.lt.s32.totalorder %s4177_s28, %s4177_s28 }
   0x8   :  { %p4184_p3 = por %p4183_p2, %p4182_p1 }
   0xa   :  { %p4185_p4 = pnand %p4184_p3, %p4178_p0 }
   0xc   :  { %4188 = shalt.err (!%p4185_p4)
}
   0xd   :  { %s4319_s29 = smov 128   ;;  %s4320_s30 = smov 8  }
   0xe   :  { %39 = dma.hbm_to_vmem [thread:$0]  %s4651_s1, 256, %s34_s25, [#allocation5], %s4319_s29, %s4319_s29, %s4320_s30  }
   0xf   :  { %s4197_s10 = scalar_lea.vmem %s58_s27, 65536  ;;  %p4202_p6 = scmp.lt.s32.totalorder %s58_s27, %s58_s27 }
  0x10   :  { %p4198_p5 = scmp.ne.s32.totalorder %s58_s27, %s4197_s10  ;;  %p4203_p7 = scmp.lt.s32.totalorder %s4197_s10, %s4197_s10 }
  0x12   :  { %p4204_p8 = por %p4203_p7, %p4202_p6 }
  0x14   :  { %p4205_p9 = pnand %p4204_p8, %p4198_p5 }
  0x16   :  { %4208 = shalt.err (!%p4205_p9)
}
  0x17   :  { %63 = dma.hbm_to_vmem [thread:$0]  %s4653_s3, 65536, %s58_s27, [#allocation8], %s4319_s29, %s4319_s29, %s4320_s30  }
  0x18   :  { %s4321_s13 = smov [#allocation10]   ;;  %s4322_s15 = smov [#allocation2]  }
  0x19   :  { %s81_s14 = sshll.u32 %s4321_s13, 4  ;;  %s21_s16 = sshll.u32 %s4322_s15, 4  ;;  %s82_s14 = int_to_ptr.vmem [resolvable:$true] %s81_s14  ;;  %s22_s16 = int_to_ptr.vmem [resolvable:$true] %s21_s16 }
  0x1a   :  { %s4217_s1 = scalar_lea.vmem %s82_s14, 512  ;;  %p4222_p11 = scmp.lt.s32.totalorder %s82_s14, %s82_s14 }
  0x1b   :  { %p4218_p10 = scmp.ne.s32.totalorder %s82_s14, %s4217_s1  ;;  %p4223_p12 = scmp.lt.s32.totalorder %s4217_s1, %s4217_s1 }
  0x1d   :  { %p4224_p13 = por %p4223_p12, %p4222_p11 }
  0x1f   :  { %p4225_p0 = pnand %p4224_p13, %p4218_p10 }
  0x21   :  { %4228 = shalt.err (!%p4225_p0)
}
  0x22   :  { %87 = dma.hbm_to_vmem [thread:$0]  %s4655_s5, 512, %s82_s14, [#allocation11], %s4319_s29, %s4319_s29, %s4320_s30  }
  0x23   :  { %s4237_s3 = scalar_lea.vmem %s22_s16, 256  ;;  %p4242_p2 = scmp.lt.s32.totalorder %s22_s16, %s22_s16 }
  0x24   :  { %p4238_p1 = scmp.ne.s32.totalorder %s22_s16, %s4237_s3  ;;  %p4243_p3 = scmp.lt.s32.totalorder %s4237_s3, %s4237_s3 }
  0x26   :  { %p4244_p4 = por %p4243_p3, %p4242_p2 }
  0x28   :  { %p4245_p5 = pnand %p4244_p4, %p4238_p1 }
  0x2a   :  { %4248 = shalt.err (!%p4245_p5)
}
  0x2b   :  { %27 = dma.hbm_to_vmem [thread:$0]  %s4650_s0, 256, %s22_s16, [#allocation3], %s4319_s29, %s4319_s29, %s4320_s30  }
  0x2c   :  { %s4323_s21 = smov [#allocation6]  }
  0x2d   :  { %s45_s22 = sshll.u32 %s4323_s21, 4  ;;  %s46_s22 = int_to_ptr.vmem [resolvable:$true] %s45_s22 }
  0x2e   :  { %s4257_s23 = scalar_lea.vmem %s46_s22, 16384  ;;  %p4262_p7 = scmp.lt.s32.totalorder %s46_s22, %s46_s22 }
  0x2f   :  { %p4258_p6 = scmp.ne.s32.totalorder %s46_s22, %s4257_s23  ;;  %p4263_p8 = scmp.lt.s32.totalorder %s4257_s23, %s4257_s23 }
  0x31   :  { %p4264_p9 = por %p4263_p8, %p4262_p7 }
  0x33   :  { %p4265_p10 = pnand %p4264_p9, %p4258_p6 }
  0x35   :  { %4268 = shalt.err (!%p4265_p10)
}
  0x36   :  { %s4324_s5 = smov 4096   ;;  %s4325_s24 = smov 256  }
  0x37   :  { %51 = dma.hbm_to_vmem [thread:$0]  %s4652_s2, 16384, %s46_s22, [#allocation5], %s4324_s5, %s4324_s5, %s4325_s24  }
  0x38   :  { %s4326_s27 = smov [#allocation9]   ;;  %s4327_s0 = smov [#allocation12]  }
  0x39   :  { %s69_s28 = sshll.u32 %s4326_s27, 4  ;;  %s94_s8 = sshll.u32 %s4327_s0, 4  ;;  %s70_s28 = int_to_ptr.vmem [resolvable:$true] %s69_s28  ;;  %s95_s8 = int_to_ptr.vmem [resolvable:$true] %s94_s8 }
  0x3a   :  { %s4277_s9 = scalar_lea.vmem %s70_s28, 512  ;;  %p4282_p12 = scmp.lt.s32.totalorder %s70_s28, %s70_s28 }
  0x3b   :  { %p4278_p11 = scmp.ne.s32.totalorder %s70_s28, %s4277_s9  ;;  %p4283_p13 = scmp.lt.s32.totalorder %s4277_s9, %s4277_s9 }
  0x3d   :  { %p4284_p0 = por %p4283_p13, %p4282_p12 }
  0x3f   :  { %p4285_p1 = pnand %p4284_p0, %p4278_p11 }
  0x41   :  { %4288 = shalt.err (!%p4285_p1)
}
  0x42   :  { %75 = dma.hbm_to_vmem [thread:$0]  %s4654_s4, 512, %s70_s28, [#allocation8], %s4319_s29, %s4319_s29, %s4320_s30  }
  0x43   :  { %s4297_s2 = scalar_lea.vmem %s95_s8, 16  ;;  %s4301_s12 = scalar_lea.vmem %s95_s8, 32 }
  0x44   :  { %p4298_p2 = scmp.ne.s32.totalorder %s95_s8, %s4297_s2  ;;  %p4302_p3 = scmp.lt.s32.totalorder %s95_s8, %s95_s8 }
  0x45   :  { %p4303_p4 = scmp.lt.s32.totalorder %s4301_s12, %s4297_s2 }
  0x47   :  { %p4304_p5 = por %p4303_p4, %p4302_p3 }
  0x49   :  { %p4305_p6 = pnand %p4304_p5, %p4298_p2 }
  0x4b   :  { %4308 = shalt.err (!%p4305_p6)
}
  0x4c   :  { %97 = dma.hbm_to_vmem [thread:$0]  %s4656_s6, 16, %s95_s8, [#allocation11]  }
  0x4d   :  { %4309 = dma.done.wait [#allocation3], 256  }
  0x4e   :  { %4310 = vsyncadd [#allocation3], 4294967040 }
  0x4f   :  { %4311 = dma.done.wait [#allocation5], 16640  }
  0x50   :  { %4312 = vsyncadd [#allocation5], 4294950656 }
  0x51   :  { %4313 = dma.done.wait [#allocation8], 66048  }
  0x52   :  { %4314 = vsyncadd [#allocation8], 4294901248 }
  0x53   :  { %4315 = dma.done.wait [#allocation11], 528  }
  0x54   :  { %4316 = vsyncadd [#allocation11], 4294966768  ;;  %v4328_v0 = vmov 0.0   ;;  %v220_v1 = vld [vmem:[#allocation6 + $0x308] sm:$0xff]  ;;  %v222_v2 = vld [vmem:[#allocation6 + $0x318] sm:$0xff]  ;;  %vm251_vm0 = vcmask 261120  }
  0x55   :  { %322 = vmatprep.mubr.f32.mxu0 %v4328_v0  ;;  %399 = vmatprep.mubr.f32.mxu1 %v4328_v0  ;;  %v219_v3 = vld [vmem:[#allocation6 + $0x300] sm:$0xff]  ;;  %v221_v4 = vld [vmem:[#allocation6 + $0x310] sm:$0xff]  ;;  %v188_v5 = vld [vmem:[#allocation6 + $0x208] sm:$0xff]  ;;  %s4329_s4 = smov 32   ;;  %s4330_s6 = smov 96   ;;  %vm1512_vm1 = vcmask 523264  }
  0x56   :  { %282 = vmatprep.subr.mxu0 %v220_v1  ;;  %359 = vmatprep.subr.mxu1 %v222_v2  ;;  %v190_v6 = vld [vmem:[#allocation6 + $0x218] sm:$0xff]  ;;  %v187_v7 = vld [vmem:[#allocation6 + $0x200] sm:$0xff]  ;;  %v189_v8 = vld [vmem:[#allocation6 + $0x210] sm:$0xff]  ;;  %s4331_s29 = smov 64   ;;  %vm1515_vm2 = vcmask 785408  }
  0x57   :  { %283 = vmatpush1.msra.mxu0 %v219_v3  ;;  %360 = vmatpush1.msra.mxu1 %v221_v4  ;;  %v156_v9 = vld [vmem:[#allocation6 + $0x108] sm:$0xff]  ;;  %v158_v10 = vld [vmem:[#allocation6 + $0x118] sm:$0xff]  ;;  %v155_v11 = vld [vmem:[#allocation6 + $0x100] sm:$0xff] }
  0x58   :  { %284 = vmatprep.subr.mxu0 %v188_v5  ;;  %361 = vmatprep.subr.mxu1 %v190_v6  ;;  %v157_v12 = vld [vmem:[#allocation6 + $0x110] sm:$0xff]  ;;  %v124_v13 = vld [vmem:[#allocation6 + $0x8] sm:$0xff]  ;;  %v126_v14 = vld [vmem:[#allocation6 + $0x18] sm:$0xff] }
  0x59   :  { %285 = vmatpush1.msra.mxu0 %v187_v7  ;;  %362 = vmatpush1.msra.mxu1 %v189_v8  ;;  %v123_v15 = vld [vmem:[#allocation6] sm:$0xff]  ;;  %v125_v16 = vld [vmem:[#allocation6 + $0x10] sm:$0xff]  ;;  %v224_v18 = vld [vmem:[#allocation6 + $0x328] sm:$0xff] }
  0x5a   :  { %286 = vmatprep.subr.mxu0 %v156_v9  ;;  %363 = vmatprep.subr.mxu1 %v158_v10  ;;  %v4410_v17 = vld [vmem:[#allocation2] sm:$0xff]  ;;  %v226_v19 = vld [vmem:[#allocation6 + $0x338] sm:$0xff]  ;;  %v225_v21 = vld [vmem:[#allocation6 + $0x330] sm:$0xff] }
  0x5b   :  { %287 = vmatpush1.msra.mxu0 %v155_v11  ;;  %364 = vmatpush1.msra.mxu1 %v157_v12  ;;  %v223_v20 = vld [vmem:[#allocation6 + $0x320] sm:$0xff]  ;;  %v192_v22 = vld [vmem:[#allocation6 + $0x228] sm:$0xff]  ;;  %v194_v23 = vld [vmem:[#allocation6 + $0x238] sm:$0xff] }
  0x5c   :  { %288 = vmatprep.subr.mxu0 %v124_v13  ;;  %365 = vmatprep.subr.mxu1 %v126_v14  ;;  %v191_v24 = vld [vmem:[#allocation6 + $0x220] sm:$0xff]  ;;  %v193_v25 = vld [vmem:[#allocation6 + $0x230] sm:$0xff]  ;;  %v4416_v26 = vld [vmem:[#allocation2 + $0x8] sm:$0xff] }
  0x5d   :  { %289 = vmatpush1.msra.mxu0 %v123_v15  ;;  %366 = vmatpush1.msra.mxu1 %v125_v16  ;;  %v160_v27 = vld [vmem:[#allocation6 + $0x128] sm:$0xff]  ;;  %v162_v28 = vld [vmem:[#allocation6 + $0x138] sm:$0xff]  ;;  %v159_v29 = vld [vmem:[#allocation6 + $0x120] sm:$0xff] }
  0x5e   :  { %3475 = vmatmul.mubr.msk.f32.vlgmr.msra.gmra.mxu0 %vm251_vm0, %v4410_v17  ;;  %3477 = vmatmul.mubr.msk.f32.vlgmr.msra.gmra.mxu1 %vm251_vm0, %v4410_v17  ;;  %v161_v30 = vld [vmem:[#allocation6 + $0x130] sm:$0xff]  ;;  %v128_v31 = vld [vmem:[#allocation6 + $0x28] sm:$0xff]  ;;  %v130_v32 = vld [vmem:[#allocation6 + $0x38] sm:$0xff] }
  0x5f   :  { %436 = vmatprep.subr.mxu0 %v224_v18  ;;  %513 = vmatprep.subr.mxu1 %v226_v19  ;;  %v127_v33 = vld [vmem:[#allocation6 + $0x20] sm:$0xff]  ;;  %v129_v34 = vld [vmem:[#allocation6 + $0x30] sm:$0xff]  ;;  %v228_v35 = vld [vmem:[#allocation6 + $0x348] sm:$0xff] }
  0x60   :  { %437 = vmatpush1.msra.mxu0 %v223_v20  ;;  %514 = vmatpush1.msra.mxu1 %v225_v21  ;;  %v230_v36 = vld [vmem:[#allocation6 + $0x358] sm:$0xff]  ;;  %v227_v37 = vld [vmem:[#allocation6 + $0x340] sm:$0xff]  ;;  %v229_v38 = vld [vmem:[#allocation6 + $0x350] sm:$0xff] }
  0x61   :  { %438 = vmatprep.subr.mxu0 %v192_v22  ;;  %515 = vmatprep.subr.mxu1 %v194_v23  ;;  %v196_v39 = vld [vmem:[#allocation6 + $0x248] sm:$0xff]  ;;  %v198_v40 = vld [vmem:[#allocation6 + $0x258] sm:$0xff]  ;;  %v195_v41 = vld [vmem:[#allocation6 + $0x240] sm:$0xff] }
  0x62   :  { %328 = vmatprep.mubr.f32.mxu0 %v4328_v0  ;;  %405 = vmatprep.mubr.f32.mxu1 %v4328_v0  ;;  %v197_v42 = vld [vmem:[#allocation6 + $0x250] sm:$0xff]  ;;  %v164_v43 = vld [vmem:[#allocation6 + $0x148] sm:$0xff]  ;;  %v166_v44 = vld [vmem:[#allocation6 + $0x158] sm:$0xff] }
  0x63   :  { %439 = vmatpush1.msra.mxu0 %v191_v24  ;;  %516 = vmatpush1.msra.mxu1 %v193_v25  ;;  %v163_v45 = vld [vmem:[#allocation6 + $0x140] sm:$0xff]  ;;  %v165_v46 = vld [vmem:[#allocation6 + $0x150] sm:$0xff]  ;;  %v132_v47 = vld [vmem:[#allocation6 + $0x48] sm:$0xff] }
  0x64   :  { %3476 = vmatmul.mubr.msk.f32.gmra.mxu0 %vm251_vm0, %v4416_v26  ;;  %3478 = vmatmul.mubr.msk.f32.gmra.mxu1 %vm251_vm0, %v4416_v26  ;;  %v134_v48 = vld [vmem:[#allocation6 + $0x58] sm:$0xff]  ;;  %v131_v49 = vld [vmem:[#allocation6 + $0x40] sm:$0xff]  ;;  %v133_v50 = vld [vmem:[#allocation6 + $0x50] sm:$0xff] }
  0x65   :  { %440 = vmatprep.subr.mxu0 %v160_v27  ;;  %517 = vmatprep.subr.mxu1 %v162_v28  ;;  %v232_v51 = vld [vmem:[#allocation6 + $0x368] sm:$0xff]  ;;  %v234_v52 = vld [vmem:[#allocation6 + $0x378] sm:$0xff]  ;;  %v231_v53 = vld [vmem:[#allocation6 + $0x360] sm:$0xff] }
  0x66   :  { %441 = vmatpush1.msra.mxu0 %v159_v29  ;;  %518 = vmatpush1.msra.mxu1 %v161_v30  ;;  %v233_v54 = vld [vmem:[#allocation6 + $0x370] sm:$0xff]  ;;  %v200_v55 = vld [vmem:[#allocation6 + $0x268] sm:$0xff]  ;;  %v202_v56 = vld [vmem:[#allocation6 + $0x278] sm:$0xff] }
  0x67   :  { %442 = vmatprep.subr.mxu0 %v128_v31  ;;  %519 = vmatprep.subr.mxu1 %v130_v32  ;;  %v199_v57 = vld [vmem:[#allocation6 + $0x260] sm:$0xff]  ;;  %v201_v58 = vld [vmem:[#allocation6 + $0x270] sm:$0xff]  ;;  %v168_v59 = vld [vmem:[#allocation6 + $0x168] sm:$0xff] }
  0x68   :  { %443 = vmatpush1.msra.mxu0 %v127_v33  ;;  %476 = vmatprep.mubr.f32.mxu0 %v4328_v0  ;;  %v170_v60 = vld [vmem:[#allocation6 + $0x178] sm:$0xff]  ;;  %v167_v61 = vld [vmem:[#allocation6 + $0x160] sm:$0xff]  ;;  %v169_v62 = vld [vmem:[#allocation6 + $0x170] sm:$0xff] }
  0x69   :  { %520 = vmatpush1.msra.mxu1 %v129_v34  ;;  %553 = vmatprep.mubr.f32.mxu1 %v4328_v0  ;;  %v136_v63 = vld [vmem:[#allocation6 + $0x68] sm:$0xff]  ;;  %v138_v1 = vld [vmem:[#allocation6 + $0x78] sm:$0xff]  ;;  %v135_v2 = vld [vmem:[#allocation6 + $0x60] sm:$0xff] }
  0x6a   :  { %3479 = vmatmul.mubr.msk.f32.vlgmr.msra.gmra.mxu0 %vm251_vm0, %v4410_v17  ;;  %3481 = vmatmul.mubr.msk.f32.vlgmr.msra.gmra.mxu1 %vm251_vm0, %v4410_v17  ;;  %v137_v3 = vld [vmem:[#allocation6 + $0x70] sm:$0xff]  ;;  %v236_v4 = vld [vmem:[#allocation6 + $0x388] sm:$0xff]  ;;  %v238_v5 = vld [vmem:[#allocation6 + $0x398] sm:$0xff] }
  0x6b   :  { %590 = vmatprep.subr.mxu0 %v228_v35  ;;  %667 = vmatprep.subr.mxu1 %v230_v36  ;;  %v235_v6 = vld [vmem:[#allocation6 + $0x380] sm:$0xff]  ;;  %v237_v7 = vld [vmem:[#allocation6 + $0x390] sm:$0xff]  ;;  %v204_v8 = vld [vmem:[#allocation6 + $0x288] sm:$0xff] }
  0x6c   :  { %591 = vmatpush1.msra.mxu0 %v227_v37  ;;  %668 = vmatpush1.msra.mxu1 %v229_v38  ;;  %v206_v9 = vld [vmem:[#allocation6 + $0x298] sm:$0xff]  ;;  %v203_v10 = vld [vmem:[#allocation6 + $0x280] sm:$0xff]  ;;  %v205_v11 = vld [vmem:[#allocation6 + $0x290] sm:$0xff] }
  0x6d   :  { %592 = vmatprep.subr.mxu0 %v196_v39  ;;  %669 = vmatprep.subr.mxu1 %v198_v40  ;;  %v172_v12 = vld [vmem:[#allocation6 + $0x188] sm:$0xff]  ;;  %v174_v13 = vld [vmem:[#allocation6 + $0x198] sm:$0xff]  ;;  %v171_v14 = vld [vmem:[#allocation6 + $0x180] sm:$0xff] }
  0x6e   :  { %482 = vmatprep.mubr.f32.mxu0 %v4328_v0  ;;  %559 = vmatprep.mubr.f32.mxu1 %v4328_v0  ;;  %v173_v15 = vld [vmem:[#allocation6 + $0x190] sm:$0xff]  ;;  %v140_v16 = vld [vmem:[#allocation6 + $0x88] sm:$0xff]  ;;  %v142_v18 = vld [vmem:[#allocation6 + $0x98] sm:$0xff] }
  0x6f   :  { %593 = vmatpush1.msra.mxu0 %v195_v41  ;;  %670 = vmatpush1.msra.mxu1 %v197_v42  ;;  %v139_v19 = vld [vmem:[#allocation6 + $0x80] sm:$0xff]  ;;  %v141_v20 = vld [vmem:[#allocation6 + $0x90] sm:$0xff]  ;;  %v240_v21 = vld [vmem:[#allocation6 + $0x3a8] sm:$0xff] }
  0x70   :  { %3480 = vmatmul.mubr.msk.f32.gmra.mxu0 %vm251_vm0, %v4416_v26  ;;  %3482 = vmatmul.mubr.msk.f32.gmra.mxu1 %vm251_vm0, %v4416_v26  ;;  %v242_v22 = vld [vmem:[#allocation6 + $0x3b8] sm:$0xff]  ;;  %v239_v23 = vld [vmem:[#allocation6 + $0x3a0] sm:$0xff]  ;;  %v241_v24 = vld [vmem:[#allocation6 + $0x3b0] sm:$0xff] }
  0x71   :  { %594 = vmatprep.subr.mxu0 %v164_v43  ;;  %671 = vmatprep.subr.mxu1 %v166_v44  ;;  %v208_v25 = vld [vmem:[#allocation6 + $0x2a8] sm:$0xff]  ;;  %v210_v27 = vld [vmem:[#allocation6 + $0x2b8] sm:$0xff]  ;;  %v207_v28 = vld [vmem:[#allocation6 + $0x2a0] sm:$0xff] }
  0x72   :  { %595 = vmatpush1.msra.mxu0 %v163_v45  ;;  %672 = vmatpush1.msra.mxu1 %v165_v46  ;;  %v209_v29 = vld [vmem:[#allocation6 + $0x2b0] sm:$0xff]  ;;  %v176_v30 = vld [vmem:[#allocation6 + $0x1a8] sm:$0xff]  ;;  %v178_v31 = vld [vmem:[#allocation6 + $0x1b8] sm:$0xff] }
  0x73   :  { %596 = vmatprep.subr.mxu0 %v132_v47  ;;  %673 = vmatprep.subr.mxu1 %v134_v48  ;;  %v175_v32 = vld [vmem:[#allocation6 + $0x1a0] sm:$0xff]  ;;  %v177_v33 = vld [vmem:[#allocation6 + $0x1b0] sm:$0xff]  ;;  %v144_v34 = vld [vmem:[#allocation6 + $0xa8] sm:$0xff] }
  0x74   :  { %597 = vmatpush1.msra.mxu0 %v131_v49  ;;  %630 = vmatprep.mubr.f32.mxu0 %v4328_v0  ;;  %v146_v35 = vld [vmem:[#allocation6 + $0xb8] sm:$0xff]  ;;  %v143_v36 = vld [vmem:[#allocation6 + $0xa0] sm:$0xff]  ;;  %v145_v37 = vld [vmem:[#allocation6 + $0xb0] sm:$0xff] }
  0x75   :  { %674 = vmatpush1.msra.mxu1 %v133_v50  ;;  %707 = vmatprep.mubr.f32.mxu1 %v4328_v0  ;;  %v244_v38 = vld [vmem:[#allocation6 + $0x3c8] sm:$0xff]  ;;  %v246_v39 = vld [vmem:[#allocation6 + $0x3d8] sm:$0xff]  ;;  %v243_v40 = vld [vmem:[#allocation6 + $0x3c0] sm:$0xff] }
  0x76   :  { %3483 = vmatmul.mubr.msk.f32.vlgmr.msra.gmra.mxu0 %vm251_vm0, %v4410_v17  ;;  %3485 = vmatmul.mubr.msk.f32.vlgmr.msra.gmra.mxu1 %vm251_vm0, %v4410_v17  ;;  %v245_v41 = vld [vmem:[#allocation6 + $0x3d0] sm:$0xff]  ;;  %v212_v42 = vld [vmem:[#allocation6 + $0x2c8] sm:$0xff]  ;;  %v214_v43 = vld [vmem:[#allocation6 + $0x2d8] sm:$0xff] }
  0x77   :  { %744 = vmatprep.subr.mxu0 %v232_v51  ;;  %821 = vmatprep.subr.mxu1 %v234_v52  ;;  %v211_v44 = vld [vmem:[#allocation6 + $0x2c0] sm:$0xff]  ;;  %v213_v45 = vld [vmem:[#allocation6 + $0x2d0] sm:$0xff]  ;;  %v180_v46 = vld [vmem:[#allocation6 + $0x1c8] sm:$0xff] }
  0x78   :  { %745 = vmatpush1.msra.mxu0 %v231_v53  ;;  %822 = vmatpush1.msra.mxu1 %v233_v54  ;;  %v182_v47 = vld [vmem:[#allocation6 + $0x1d8] sm:$0xff]  ;;  %v179_v48 = vld [vmem:[#allocation6 + $0x1c0] sm:$0xff]  ;;  %v181_v49 = vld [vmem:[#allocation6 + $0x1d0] sm:$0xff] }
  0x79   :  { %746 = vmatprep.subr.mxu0 %v200_v55  ;;  %823 = vmatprep.subr.mxu1 %v202_v56  ;;  %v148_v50 = vld [vmem:[#allocation6 + $0xc8] sm:$0xff]  ;;  %v150_v51 = vld [vmem:[#allocation6 + $0xd8] sm:$0xff]  ;;  %v147_v52 = vld [vmem:[#allocation6 + $0xc0] sm:$0xff] }
  0x7a   :  { %636 = vmatprep.mubr.f32.mxu0 %v4328_v0  ;;  %713 = vmatprep.mubr.f32.mxu1 %v4328_v0  ;;  %v149_v53 = vld [vmem:[#allocation6 + $0xd0] sm:$0xff]  ;;  %v248_v54 = vld [vmem:[#allocation6 + $0x3e8] sm:$0xff]  ;;  %v250_v55 = vld [vmem:[#allocation6 + $0x3f8] sm:$0xff] }
  0x7b   :  { %747 = vmatpush1.msra.mxu0 %v199_v57  ;;  %824 = vmatpush1.msra.mxu1 %v201_v58  ;;  %v247_v56 = vld [vmem:[#allocation6 + $0x3e0] sm:$0xff]  ;;  %v249_v57 = vld [vmem:[#allocation6 + $0x3f0] sm:$0xff]  ;;  %v216_v58 = vld [vmem:[#allocation6 + $0x2e8] sm:$0xff] }
  0x7c   :  { %3484 = vmatmul.mubr.msk.f32.gmra.mxu0 %vm251_vm0, %v4416_v26  ;;  %3486 = vmatmul.mubr.msk.f32.gmra.mxu1 %vm251_vm0, %v4416_v26 }
  0x7d   :  { %748 = vmatprep.subr.mxu0 %v168_v59  ;;  %825 = vmatprep.subr.mxu1 %v170_v60  ;;  %v218_v59 = vld [vmem:[#allocation6 + $0x2f8] sm:$0xff]  ;;  %v215_v60 = vld [vmem:[#allocation6 + $0x2e0] sm:$0xff] }
  0x7e   :  { %749 = vmatpush1.msra.mxu0 %v167_v61  ;;  %826 = vmatpush1.msra.mxu1 %v169_v62  ;;  %v217_v61 = vld [vmem:[#allocation6 + $0x2f0] sm:$0xff]  ;;  %v184_v62 = vld [vmem:[#allocation6 + $0x1e8] sm:$0xff] }
  0x7f   :  { %750 = vmatprep.subr.mxu0 %v136_v63  ;;  %827 = vmatprep.subr.mxu1 %v138_v1  ;;  %v186_v63 = vld [vmem:[#allocation6 + $0x1f8] sm:$0xff]  ;;  %v183_v1 = vld [vmem:[#allocation6 + $0x1e0] sm:$0xff] }
  0x80   :  { %751 = vmatpush1.msra.mxu0 %v135_v2  ;;  %784 = vmatprep.mubr.f32.mxu0 %v4328_v0  ;;  %v185_v2 = vld [vmem:[#allocation6 + $0x1f0] sm:$0xff] }
  0x81   :  { %828 = vmatpush1.msra.mxu1 %v137_v3  ;;  %861 = vmatprep.mubr.f32.mxu1 %v4328_v0  ;;  %v152_v3 = vld [vmem:[#allocation6 + $0xe8] sm:$0xff] }
  0x82   :  { %3487 = vmatmul.mubr.msk.f32.vlgmr.msra.gmra.mxu0 %vm251_vm0, %v4410_v17  ;;  %3489 = vmatmul.mubr.msk.f32.vlgmr.msra.gmra.mxu1 %vm251_vm0, %v4410_v17 }
  0x83   :  { %898 = vmatprep.subr.mxu0 %v236_v4  ;;  %975 = vmatprep.subr.mxu1 %v238_v5  ;;  %v154_v4 = vld [vmem:[#allocation6 + $0xf8] sm:$0xff]  ;;  %v151_v5 = vld [vmem:[#allocation6 + $0xe0] sm:$0xff] }
  0x84   :  { %899 = vmatpush1.msra.mxu0 %v235_v6  ;;  %976 = vmatpush1.msra.mxu1 %v237_v7  ;;  %v153_v6 = vld [vmem:[#allocation6 + $0xf0] sm:$0xff] }
  0x85   :  { %900 = vmatprep.subr.mxu0 %v204_v8  ;;  %977 = vmatprep.subr.mxu1 %v206_v9  ;;  %v4498_v7 = vld [vmem:[#allocation4] sm:$0xff]  ;;  %v2101_v8 = vld [vmem:[#allocation10 + $0x18] sm:$0xff] }
  0x86   :  { %790 = vmatprep.mubr.f32.mxu0 %v4328_v0  ;;  %867 = vmatprep.mubr.f32.mxu1 %v4328_v0  ;;  %v2097_v9 = vld [vmem:[#allocation9 + $0x18] sm:$0xff] }
  0x87   :  { %901 = vmatpush1.msra.mxu0 %v203_v10  ;;  %978 = vmatpush1.msra.mxu1 %v205_v11  ;;  %v4508_v10 = vld [vmem:[#allocation4 + $0x8] sm:$0xff]  ;;  %v2100_v11 = vld [vmem:[#allocation10 + $0x10] sm:$0xff] }
  0x88   :  { %3488 = vmatmul.mubr.msk.f32.gmra.mxu0 %vm251_vm0, %v4416_v26  ;;  %3490 = vmatmul.mubr.msk.f32.gmra.mxu1 %vm251_vm0, %v4416_v26 }
  0x89   :  { %902 = vmatprep.subr.mxu0 %v172_v12  ;;  %979 = vmatprep.subr.mxu1 %v174_v13  ;;  %v2096_v12 = vld [vmem:[#allocation9 + $0x10] sm:$0xff]  ;;  %v2095_v13 = vld [vmem:[#allocation9 + $0x8] sm:$0xff] }
  0x8a   :  { %903 = vmatpush1.msra.mxu0 %v171_v14  ;;  %980 = vmatpush1.msra.mxu1 %v173_v15  ;;  %v2098_v14 = vld [vmem:[#allocation10] sm:$0xff] }
  0x8b   :  { %904 = vmatprep.subr.mxu0 %v140_v16  ;;  %981 = vmatprep.subr.mxu1 %v142_v18  ;;  %v2094_v15 = vld [vmem:[#allocation9] sm:$0xff]  ;;  %v1613_v16 = vld [vmem:[#allocation7 + $0xf8] sm:$0xff] }
  0x8c   :  { %905 = vmatpush1.msra.mxu0 %v139_v19  ;;  %938 = vmatprep.mubr.f32.mxu0 %v4328_v0  ;;  %v1645_v18 = vld [vmem:[#allocation7 + $0x1f8] sm:$0xff] }
  0x8d   :  { %982 = vmatpush1.msra.mxu1 %v141_v20  ;;  %1015 = vmatprep.mubr.f32.mxu1 %v4328_v0  ;;  %v1597_v19 = vld [vmem:[#allocation7 + $0x78] sm:$0xff] }
  0x8e   :  { %3491 = vmatmul.mubr.msk.f32.vlgmr.msra.gmra.mxu0 %vm251_vm0, %v4410_v17  ;;  %3493 = vmatmul.mubr.msk.f32.vlgmr.msra.gmra.mxu1 %vm251_vm0, %v4410_v17  ;;  %v1629_v20 = vld [vmem:[#allocation7 + $0x178] sm:$0xff] }
  0x8f   :  { %1052 = vmatprep.subr.mxu0 %v240_v21  ;;  %1129 = vmatprep.subr.mxu1 %v242_v22  ;;  %v1612_v21 = vld [vmem:[#allocation7 + $0xf0] sm:$0xff] }
  0x90   :  { %1053 = vmatpush1.msra.mxu0 %v239_v23  ;;  %1130 = vmatpush1.msra.mxu1 %v241_v24  ;;  %v1644_v22 = vld [vmem:[#allocation7 + $0x1f0] sm:$0xff] }
  0x91   :  { %1054 = vmatprep.subr.mxu0 %v208_v25  ;;  %1131 = vmatprep.subr.mxu1 %v210_v27  ;;  %v1596_v23 = vld [vmem:[#allocation7 + $0x70] sm:$0xff]  ;;  %v1611_v25 = vld [vmem:[#allocation7 + $0xe8] sm:$0xff] }
  0x92   :  { %944 = vmatprep.mubr.f32.mxu0 %v4328_v0  ;;  %1021 = vmatprep.mubr.f32.mxu1 %v4328_v0  ;;  %v1628_v24 = vld [vmem:[#allocation7 + $0x170] sm:$0xff]  ;;  %v1643_v27 = vld [vmem:[#allocation7 + $0x1e8] sm:$0xff] }
  0x93   :  { %1055 = vmatpush1.msra.mxu0 %v207_v28  ;;  %1132 = vmatpush1.msra.mxu1 %v209_v29  ;;  %v1627_v28 = vld [vmem:[#allocation7 + $0x168] sm:$0xff]  ;;  %v1610_v29 = vld [vmem:[#allocation7 + $0xe0] sm:$0xff] }
  0x94   :  { %3492 = vmatmul.mubr.msk.f32.gmra.mxu0 %vm251_vm0, %v4416_v26  ;;  %3494 = vmatmul.mubr.msk.f32.gmra.mxu1 %vm251_vm0, %v4416_v26 }
  0x95   :  { %1056 = vmatprep.subr.mxu0 %v176_v30  ;;  %1133 = vmatprep.subr.mxu1 %v178_v31  ;;  %v1642_v30 = vld [vmem:[#allocation7 + $0x1e0] sm:$0xff] }
  0x96   :  { %1057 = vmatpush1.msra.mxu0 %v175_v32  ;;  %1134 = vmatpush1.msra.mxu1 %v177_v33  ;;  %v1626_v31 = vld [vmem:[#allocation7 + $0x160] sm:$0xff]  ;;  %v1609_v32 = vld [vmem:[#allocation7 + $0xd8] sm:$0xff] }
  0x97   :  { %1058 = vmatprep.subr.mxu0 %v144_v34  ;;  %1135 = vmatprep.subr.mxu1 %v146_v35  ;;  %v1641_v33 = vld [vmem:[#allocation7 + $0x1d8] sm:$0xff] }
  0x98   :  { %1059 = vmatpush1.msra.mxu0 %v143_v36  ;;  %1092 = vmatprep.mubr.f32.mxu0 %v4328_v0  ;;  %v1593_v34 = vld [vmem:[#allocation7 + $0x58] sm:$0xff]  ;;  %v1608_v36 = vld [vmem:[#allocation7 + $0xd0] sm:$0xff] }
  0x99   :  { %1136 = vmatpush1.msra.mxu1 %v145_v37  ;;  %1169 = vmatprep.mubr.f32.mxu1 %v4328_v0  ;;  %v1625_v35 = vld [vmem:[#allocation7 + $0x158] sm:$0xff]  ;;  %v1640_v37 = vld [vmem:[#allocation7 + $0x1d0] sm:$0xff] }
  0x9a   :  { %3495 = vmatmul.mubr.msk.f32.vlgmr.msra.gmra.mxu0 %vm251_vm0, %v4410_v17  ;;  %3497 = vmatmul.mubr.msk.f32.vlgmr.msra.gmra.mxu1 %vm251_vm0, %v4410_v17 }
  0x9b   :  { %1206 = vmatprep.subr.mxu0 %v244_v38  ;;  %1283 = vmatprep.subr.mxu1 %v246_v39  ;;  %v1592_v38 = vld [vmem:[#allocation7 + $0x50] sm:$0xff] }
  0x9c   :  { %1207 = vmatpush1.msra.mxu0 %v243_v40  ;;  %1284 = vmatpush1.msra.mxu1 %v245_v41  ;;  %v1624_v39 = vld [vmem:[#allocation7 + $0x150] sm:$0xff]  ;;  %v1607_v40 = vld [vmem:[#allocation7 + $0xc8] sm:$0xff] }
  0x9d   :  { %1208 = vmatprep.subr.mxu0 %v212_v42  ;;  %1285 = vmatprep.subr.mxu1 %v214_v43  ;;  %v1639_v41 = vld [vmem:[#allocation7 + $0x1c8] sm:$0xff] }
  0x9e   :  { %1098 = vmatprep.mubr.f32.mxu0 %v4328_v0  ;;  %1175 = vmatprep.mubr.f32.mxu1 %v4328_v0  ;;  %v1591_v42 = vld [vmem:[#allocation7 + $0x48] sm:$0xff] }
  0x9f   :  { %1209 = vmatpush1.msra.mxu0 %v211_v44  ;;  %1286 = vmatpush1.msra.mxu1 %v213_v45  ;;  %v1623_v43 = vld [vmem:[#allocation7 + $0x148] sm:$0xff]  ;;  %v1606_v44 = vld [vmem:[#allocation7 + $0xc0] sm:$0xff] }
  0xa0   :  { %3496 = vmatmul.mubr.msk.f32.gmra.mxu0 %vm251_vm0, %v4416_v26  ;;  %3498 = vmatmul.mubr.msk.f32.gmra.mxu1 %vm251_vm0, %v4416_v26  ;;  %v1638_v45 = vld [vmem:[#allocation7 + $0x1c0] sm:$0xff] }
  0xa1   :  { %1210 = vmatprep.subr.mxu0 %v180_v46  ;;  %1287 = vmatprep.subr.mxu1 %v182_v47  ;;  %v1590_v46 = vld [vmem:[#allocation7 + $0x40] sm:$0xff] }
  0xa2   :  { %1211 = vmatpush1.msra.mxu0 %v179_v48  ;;  %1288 = vmatpush1.msra.mxu1 %v181_v49  ;;  %v1622_v47 = vld [vmem:[#allocation7 + $0x140] sm:$0xff]  ;;  %v1605_v48 = vld [vmem:[#allocation7 + $0xb8] sm:$0xff] }
  0xa3   :  { %1212 = vmatprep.subr.mxu0 %v148_v50  ;;  %1289 = vmatprep.subr.mxu1 %v150_v51  ;;  %v1637_v49 = vld [vmem:[#allocation7 + $0x1b8] sm:$0xff] }
  0xa4   :  { %1213 = vmatpush1.msra.mxu0 %v147_v52  ;;  %1246 = vmatprep.mubr.f32.mxu0 %v4328_v0  ;;  %v1589_v50 = vld [vmem:[#allocation7 + $0x38] sm:$0xff]  ;;  %v1604_v52 = vld [vmem:[#allocation7 + $0xb0] sm:$0xff] }
  0xa5   :  { %1290 = vmatpush1.msra.mxu1 %v149_v53  ;;  %1323 = vmatprep.mubr.f32.mxu1 %v4328_v0  ;;  %v1621_v51 = vld [vmem:[#allocation7 + $0x138] sm:$0xff]  ;;  %v1636_v53 = vld [vmem:[#allocation7 + $0x1b0] sm:$0xff] }
  0xa6   :  { %3499 = vmatmul.mubr.msk.f32.vlgmr.msra.gmra.mxu0 %vm251_vm0, %v4410_v17  ;;  %3501 = vmatmul.mubr.msk.f32.vlgmr.msra.gmra.mxu1 %vm251_vm0, %v4410_v17 }
  0xa7   :  { %1360 = vmatprep.subr.mxu0 %v248_v54  ;;  %1437 = vmatprep.subr.mxu1 %v250_v55  ;;  %v1588_v54 = vld [vmem:[#allocation7 + $0x30] sm:$0xff] }
  0xa8   :  { %1361 = vmatpush1.msra.mxu0 %v247_v56  ;;  %1438 = vmatpush1.msra.mxu1 %v249_v57  ;;  %v1620_v55 = vld [vmem:[#allocation7 + $0x130] sm:$0xff]  ;;  %v1603_v56 = vld [vmem:[#allocation7 + $0xa8] sm:$0xff] }
  0xa9   :  { %1362 = vmatprep.subr.mxu0 %v216_v58  ;;  %1439 = vmatprep.subr.mxu1 %v218_v59  ;;  %v1635_v57 = vld [vmem:[#allocation7 + $0x1a8] sm:$0xff] }
  0xaa   :  { %1252 = vmatprep.mubr.f32.mxu0 %v4328_v0  ;;  %1329 = vmatprep.mubr.f32.mxu1 %v4328_v0  ;;  %v1587_v58 = vld [vmem:[#allocation7 + $0x28] sm:$0xff] }
  0xab   :  { %1363 = vmatpush1.msra.mxu0 %v215_v60  ;;  %1440 = vmatpush1.msra.mxu1 %v217_v61  ;;  %v1619_v59 = vld [vmem:[#allocation7 + $0x128] sm:$0xff]  ;;  %v1602_v60 = vld [vmem:[#allocation7 + $0xa0] sm:$0xff] }
  0xac   :  { %3500 = vmatmul.mubr.msk.f32.gmra.mxu0 %vm251_vm0, %v4416_v26  ;;  %3502 = vmatmul.mubr.msk.f32.gmra.mxu1 %vm251_vm0, %v4416_v26  ;;  %v1634_v61 = vld [vmem:[#allocation7 + $0x1a0] sm:$0xff] }
  0xad   :  { %1364 = vmatprep.subr.mxu0 %v184_v62  ;;  %1441 = vmatprep.subr.mxu1 %v186_v63  ;;  %v1586_v62 = vld [vmem:[#allocation7 + $0x20] sm:$0xff] }
  0xae   :  { %1365 = vmatpush1.msra.mxu0 %v183_v1  ;;  %1442 = vmatpush1.msra.mxu1 %v185_v2  ;;  %v1618_v63 = vld [vmem:[#allocation7 + $0x120] sm:$0xff]  ;;  %v1601_v1 = vld [vmem:[#allocation7 + $0x98] sm:$0xff] }
  0xaf   :  { %1366 = vmatprep.subr.mxu0 %v152_v3  ;;  %1443 = vmatprep.subr.mxu1 %v154_v4  ;;  %v1633_v2 = vld [vmem:[#allocation7 + $0x198] sm:$0xff] }
  0xb0   :  { %1367 = vmatpush1.msra.mxu0 %v151_v5  ;;  %1400 = vmatprep.mubr.f32.mxu0 %v4328_v0  ;;  %v1585_v3 = vld [vmem:[#allocation7 + $0x18] sm:$0xff]  ;;  %v1600_v5 = vld [vmem:[#allocation7 + $0x90] sm:$0xff] }
  0xb1   :  { %1444 = vmatpush1.msra.mxu1 %v153_v6  ;;  %1477 = vmatprep.mubr.f32.mxu1 %v4328_v0  ;;  %v1617_v4 = vld [vmem:[#allocation7 + $0x118] sm:$0xff]  ;;  %v1632_v6 = vld [vmem:[#allocation7 + $0x190] sm:$0xff] }
  0xb2   :  { %3503 = vmatmul.mubr.msk.f32.vlgmr.msra.gmra.mxu0 %vm251_vm0, %v4410_v17  ;;  %3505 = vmatmul.mubr.msk.f32.vlgmr.msra.gmra.mxu1 %vm251_vm0, %v4410_v17 }
  0xb3   :  { %1406 = vmatprep.mubr.f32.mxu0 %v4328_v0  ;;  %1483 = vmatprep.mubr.f32.mxu1 %v4328_v0  ;;  %v2099_v0 = vld [vmem:[#allocation10 + $0x8] sm:$0xff] }
  0xb4   :  { %1492 = vrot.lane.b32.xlu0 %v4498_v7, %s4329_s4  ;;  %1504 = vrot.lane.b32.xlu1 %v4498_v7, %s4330_s6 }
  0xb5   :  { %4132 = vmatprep.subr.mxu0 %v2101_v8  ;;  %4143 = vmatprep.subr.mxu1 %v2097_v9 }
  0xb6   :  { %3504 = vmatmul.mubr.msk.f32.gmra.mxu0 %vm251_vm0, %v4416_v26  ;;  %3506 = vmatmul.mubr.msk.f32.gmra.mxu1 %vm251_vm0, %v4416_v26 }
  0xb7   :  { %4133 = vmatpush3.msra.mxu0 %v2101_v8  ;;  %4144 = vmatpush3.msra.mxu1 %v2097_v9  ;;  %v1584_v8 = vld [vmem:[#allocation7 + $0x10] sm:$0xff] }
  0xb8   :  { %1498 = vrot.lane.b32.xlu0 %v4498_v7, %s4331_s29  ;;  %1494 = vrot.lane.b32.xlu1 %v4508_v10, %s4329_s4  ;;  %v1616_v9 = vld [vmem:[#allocation7 + $0x110] sm:$0xff] }
  0xb9   :  { %4134 = vmatprep.subr.mxu0 %v2100_v11  ;;  %4145 = vmatprep.subr.mxu1 %v2096_v12 }
  0xba   :  { %4135 = vmatpush3.msra.mxu0 %v2100_v11  ;;  %4146 = vmatpush3.msra.mxu1 %v2096_v12  ;;  %v1599_v11 = vld [vmem:[#allocation7 + $0x88] sm:$0xff] }
  0xbb   :  { %4136 = vmatprep.subr.mxu0 %v2099_v0  ;;  %4147 = vmatprep.subr.mxu1 %v2095_v13  ;;  %v1631_v12 = vld [vmem:[#allocation7 + $0x188] sm:$0xff] }
  0xbc   :  { %1500 = vrot.lane.b32.xlu0 %v4508_v10, %s4331_s29  ;;  %1506 = vrot.lane.b32.xlu1 %v4508_v10, %s4330_s6 }
  0xbd   :  { %4137 = vmatpush3.msra.mxu0 %v2099_v0  ;;  %4148 = vmatpush3.msra.mxu1 %v2095_v13  ;;  %v1583_v0 = vld [vmem:[#allocation7 + $0x8] sm:$0xff] }
  0xbe   :  { %4138 = vmatprep.subr.mxu0 %v2098_v14  ;;  %4149 = vmatprep.subr.mxu1 %v2094_v15  ;;  %v1615_v13 = vld [vmem:[#allocation7 + $0x108] sm:$0xff] }
  0xbf   :  { %4139 = vmatpush3.msra.mxu0 %v2098_v14  ;;  %4140 = vmatprep.mubr.msk.f32.mxu0 %vm251_vm0, %v4498_v7  ;;  %v1598_v14 = vld [vmem:[#allocation7 + $0x80] sm:$0xff] }
  0xc0   :  { %4150 = vmatpush3.msra.mxu1 %v2094_v15  ;;  %4151 = vmatprep.mubr.msk.f32.mxu1 %vm251_vm0, %v4410_v17  ;;  %v1595_v17 = vld [vmem:[#allocation7 + $0x68] sm:$0xff]  ;;  %v1630_v15 = vld [vmem:[#allocation7 + $0x180] sm:$0xff] }
  0xc1   :  { %4141 = vmatmul.mubr.msk.f32.vlgmr.msra.gmra.mxu0 %vm251_vm0, %v4508_v10  ;;  %4152 = vmatmul.mubr.msk.f32.vlgmr.msra.gmra.mxu1 %vm251_vm0, %v4416_v26  ;;  %v1594_v26 = vld [vmem:[#allocation7 + $0x60] sm:$0xff] }
  0xc2   :  { %3524 = vmatprep.subr.mxu0 %v1613_v16  ;;  %3562 = vmatprep.subr.mxu1 %v1645_v18  ;;  %v1582_v16 = vld [vmem:[#allocation7] sm:$0xff] }
  0xc3   :  { %3525 = vmatpush3.msra.mxu0 %v1597_v19  ;;  %3563 = vmatpush3.msra.mxu1 %v1629_v20  ;;  %v1614_v18 = vld [vmem:[#allocation7 + $0x100] sm:$0xff]  ;;  %v1677_v19 = vld [vmem:[#allocation7 + $0x2f8] sm:$0xff] }
  0xc4   :  { %3526 = vmatprep.subr.mxu0 %v1612_v21  ;;  %3564 = vmatprep.subr.mxu1 %v1644_v22  ;;  %v1709_v20 = vld [vmem:[#allocation7 + $0x3f8] sm:$0xff] }
  0xc5   :  { %3527 = vmatpush3.msra.mxu0 %v1596_v23  ;;  %3565 = vmatpush3.msra.mxu1 %v1628_v24 }
  0xc6   :  { %3528 = vmatprep.subr.mxu0 %v1611_v25  ;;  %3566 = vmatprep.subr.mxu1 %v1643_v27 }
  0xc7   :  { %3529 = vmatpush3.msra.mxu0 %v1595_v17  ;;  %3567 = vmatpush3.msra.mxu1 %v1627_v28 }
  0xc8   :  { %3530 = vmatprep.subr.mxu0 %v1610_v29  ;;  %3568 = vmatprep.subr.mxu1 %v1642_v30 }
  0xc9   :  { %3531 = vmatpush3.msra.mxu0 %v1594_v26  ;;  %3569 = vmatpush3.msra.mxu1 %v1626_v31 }
  0xca   :  { %3532 = vmatprep.subr.mxu0 %v1609_v32  ;;  %3570 = vmatprep.subr.mxu1 %v1641_v33 }
  0xcb   :  { %3533 = vmatpush3.msra.mxu0 %v1593_v34  ;;  %3571 = vmatpush3.msra.mxu1 %v1625_v35 }
  0xcc   :  { %3534 = vmatprep.subr.mxu0 %v1608_v36  ;;  %3572 = vmatprep.subr.mxu1 %v1640_v37 }
  0xcd   :  { %3535 = vmatpush3.msra.mxu0 %v1592_v38  ;;  %3573 = vmatpush3.msra.mxu1 %v1624_v39 }
  0xce   :  { %3536 = vmatprep.subr.mxu0 %v1607_v40  ;;  %3574 = vmatprep.subr.mxu1 %v1639_v41  ;;  %v1661_v41 = vld [vmem:[#allocation7 + $0x278] sm:$0xff] }
  0xcf   :  { %3537 = vmatpush3.msra.mxu0 %v1591_v42  ;;  %3575 = vmatpush3.msra.mxu1 %v1623_v43  ;;  %v1693_v43 = vld [vmem:[#allocation7 + $0x378] sm:$0xff] }
  0xd0   :  { %3538 = vmatprep.subr.mxu0 %v1606_v44  ;;  %3576 = vmatprep.subr.mxu1 %v1638_v45  ;;  %v1676_v44 = vld [vmem:[#allocation7 + $0x2f0] sm:$0xff] }
  0xd1   :  { %3539 = vmatpush3.msra.mxu0 %v1590_v46  ;;  %3577 = vmatpush3.msra.mxu1 %v1622_v47  ;;  %v1708_v45 = vld [vmem:[#allocation7 + $0x3f0] sm:$0xff] }
  0xd2   :  { %3540 = vmatprep.subr.mxu0 %v1605_v48  ;;  %3578 = vmatprep.subr.mxu1 %v1637_v49  ;;  %v1660_v47 = vld [vmem:[#allocation7 + $0x270] sm:$0xff] }
  0xd3   :  { %3541 = vmatpush3.msra.mxu0 %v1589_v50  ;;  %3579 = vmatpush3.msra.mxu1 %v1621_v51  ;;  %v1692_v50 = vld [vmem:[#allocation7 + $0x370] sm:$0xff] }
  0xd4   :  { %3542 = vmatprep.subr.mxu0 %v1604_v52  ;;  %3580 = vmatprep.subr.mxu1 %v1636_v53  ;;  %v1675_v52 = vld [vmem:[#allocation7 + $0x2e8] sm:$0xff] }
  0xd5   :  { %3543 = vmatpush3.msra.mxu0 %v1588_v54  ;;  %3581 = vmatpush3.msra.mxu1 %v1620_v55  ;;  %v1707_v53 = vld [vmem:[#allocation7 + $0x3e8] sm:$0xff] }
  0xd6   :  { %3544 = vmatprep.subr.mxu0 %v1603_v56  ;;  %3582 = vmatprep.subr.mxu1 %v1635_v57  ;;  %v1691_v55 = vld [vmem:[#allocation7 + $0x368] sm:$0xff] }
  0xd7   :  { %3545 = vmatpush3.msra.mxu0 %v1587_v58  ;;  %3583 = vmatpush3.msra.mxu1 %v1619_v59  ;;  %v1659_v57 = vld [vmem:[#allocation7 + $0x268] sm:$0xff] }
  0xd8   :  { %3546 = vmatprep.subr.mxu0 %v1602_v60  ;;  %3584 = vmatprep.subr.mxu1 %v1634_v61  ;;  %v1674_v60 = vld [vmem:[#allocation7 + $0x2e0] sm:$0xff] }
  0xd9   :  { %3547 = vmatpush3.msra.mxu0 %v1586_v62  ;;  %3585 = vmatpush3.msra.mxu1 %v1618_v63  ;;  %v1706_v61 = vld [vmem:[#allocation7 + $0x3e0] sm:$0xff] }
  0xda   :  { %3548 = vmatprep.subr.mxu0 %v1601_v1  ;;  %3586 = vmatprep.subr.mxu1 %v1633_v2  ;;  %v1658_v62 = vld [vmem:[#allocation7 + $0x260] sm:$0xff]  ;;  %v1673_v2 = vld [vmem:[#allocation7 + $0x2d8] sm:$0xff] }
  0xdb   :  { %3549 = vmatpush3.msra.mxu0 %v1585_v3  ;;  %3587 = vmatpush3.msra.mxu1 %v1617_v4  ;;  %v1690_v1 = vld [vmem:[#allocation7 + $0x360] sm:$0xff]  ;;  %v1705_v4 = vld [vmem:[#allocation7 + $0x3d8] sm:$0xff] }
  0xdc   :  { %3550 = vmatprep.subr.mxu0 %v1600_v5  ;;  %3588 = vmatprep.subr.mxu1 %v1632_v6  ;;  %v1657_v5 = vld [vmem:[#allocation7 + $0x258] sm:$0xff] }
  0xdd   :  { %3551 = vmatpush3.msra.mxu0 %v1584_v8  ;;  %3589 = vmatpush3.msra.mxu1 %v1616_v9  ;;  %v1689_v6 = vld [vmem:[#allocation7 + $0x358] sm:$0xff]  ;;  %v1672_v8 = vld [vmem:[#allocation7 + $0x2d0] sm:$0xff] }
  0xde   :  { %3552 = vmatprep.subr.mxu0 %v1599_v11  ;;  %3590 = vmatprep.subr.mxu1 %v1631_v12  ;;  %v1704_v9 = vld [vmem:[#allocation7 + $0x3d0] sm:$0xff] }
  0xdf   :  { %3553 = vmatpush3.msra.mxu0 %v1583_v0  ;;  %3591 = vmatpush3.msra.mxu1 %v1615_v13  ;;  %v1656_v11 = vld [vmem:[#allocation7 + $0x250] sm:$0xff]  ;;  %v1671_v0 = vld [vmem:[#allocation7 + $0x2c8] sm:$0xff] }
  0xe0   :  { %3554 = vmatprep.subr.mxu0 %v1598_v14  ;;  %3592 = vmatprep.subr.mxu1 %v1630_v15  ;;  %v1688_v12 = vld [vmem:[#allocation7 + $0x350] sm:$0xff]  ;;  %v1703_v13 = vld [vmem:[#allocation7 + $0x3c8] sm:$0xff] }
  0xe1   :  { %3555 = vmatpush3.msra.mxu0 %v1582_v16  ;;  %3593 = vmatpush3.msra.mxu1 %v1614_v18  ;;  %v1655_v14 = vld [vmem:[#allocation7 + $0x248] sm:$0xff]  ;;  %v1670_v16 = vld [vmem:[#allocation7 + $0x2c0] sm:$0xff] }
  0xe2   :  { %3600 = vmatprep.subr.mxu0 %v1677_v19  ;;  %3638 = vmatprep.subr.mxu1 %v1709_v20  ;;  %v1687_v15 = vld [vmem:[#allocation7 + $0x348] sm:$0xff]  ;;  %v1702_v18 = vld [vmem:[#allocation7 + $0x3c0] sm:$0xff] }
  0xe3   :  { %v1654_v19 = vld [vmem:[#allocation7 + $0x240] sm:$0xff] }
  0xe4   :  { %v1686_v20 = vld [vmem:[#allocation7 + $0x340] sm:$0xff] }
 0x11e   :  { %v324_v21 = vpop.f32.mrf.mxu0  ;;  %v401_v22 = vpop.f32.mrf.mxu1 }
 0x120   :  { %v326_v23 = vpop.f32.mrf.mxu0  ;;  %v403_v24 = vpop.f32.mrf.mxu1 }
 0x124   :  { %v330_v28 = vpop.f32.mrf.mxu0  ;;  %v407_v29 = vpop.f32.mrf.mxu1 }
 0x126   :  { %v1493_v25 = vpop.permute.xlu0 %1492  ;;  %v1505_v27 = vpop.permute.xlu1 %1504 }
 0x127   :  { %v1510_v17 = vsel %vm251_vm0, %v4498_v7, %v1493_v25  ;;  %v332_v34 = vpop.f32.mrf.mxu0  ;;  %v409_v7 = vpop.f32.mrf.mxu1  ;;  %v1668_v25 = vld [vmem:[#allocation7 + $0x2b0] sm:$0xff] }
 0x12a   :  { %v1499_v30 = vpop.permute.xlu0 %1498  ;;  %v1495_v26 = vpop.permute.xlu1 %1494 }
 0x12b   :  { %v1513_v31 = vsel %vm1512_vm1, %v1510_v17, %v1499_v30  ;;  %v1511_v33 = vsel %vm251_vm0, %v4508_v10, %v1495_v26  ;;  %v4542_v46 = vpop.f32.mrf.mxu0  ;;  %v4545_v49 = vpop.f32.mrf.mxu1  ;;  %v1652_v17 = vld [vmem:[#allocation7 + $0x230] sm:$0xff]  ;;  %v1699_v30 = vld [vmem:[#allocation7 + $0x3a8] sm:$0xff] }
 0x12c   :  { %v4530_v32 = vsel %vm1515_vm2, %v1513_v31, %v1505_v27  ;;  %v1700_v27 = vld [vmem:[#allocation7 + $0x3b0] sm:$0xff]  ;;  %v1651_v26 = vld [vmem:[#allocation7 + $0x228] sm:$0xff] }
 0x12d   :  { %v1519_v35 = vmul.f32 %v4530_v32, %v326_v23  ;;  %v1521_v36 = vmul.f32 %v4530_v32, %v403_v24  ;;  %v1518_v37 = vmul.f32 %v4530_v32, %v324_v21  ;;  %v1520_v38 = vmul.f32 %v4530_v32, %v401_v22  ;;  %v480_v56 = vpop.f32.mrf.mxu0  ;;  %v557_v59 = vpop.f32.mrf.mxu1  ;;  %v1669_v21 = vld [vmem:[#allocation7 + $0x2b8] sm:$0xff]  ;;  %v1683_v31 = vld [vmem:[#allocation7 + $0x328] sm:$0xff] }
 0x12e   :  { %v1501_v39 = vpop.permute.xlu0 %1500  ;;  %v1507_v40 = vpop.permute.xlu1 %1506  ;;  %v1523_v63 = vmul.f32 %v4530_v32, %v480_v56  ;;  %v1525_v3 = vmul.f32 %v4530_v32, %v557_v59  ;;  %v1701_v22 = vld [vmem:[#allocation7 + $0x3b8] sm:$0xff] }
 0x12f   :  { %v1514_v42 = vsel %vm1512_vm1, %v1511_v33, %v1501_v39  ;;  %2320 = vmatprep.mubr.f32.mxu0 %v1519_v35  ;;  %2395 = vmatprep.mubr.f32.mxu1 %v1521_v36  ;;  %v1653_v23 = vld [vmem:[#allocation7 + $0x238] sm:$0xff]  ;;  %v1666_v33 = vld [vmem:[#allocation7 + $0x2a0] sm:$0xff] }
 0x130   :  { %v4540_v10 = vsel %vm1515_vm2, %v1514_v42, %v1507_v40  ;;  %2321 = vmatmul.mubr.f32.vlgmr.msra.gmra.mxu0 %v1518_v37  ;;  %2396 = vmatmul.mubr.f32.vlgmr.msra.gmra.mxu1 %v1520_v38  ;;  %v1685_v24 = vld [vmem:[#allocation7 + $0x338] sm:$0xff]  ;;  %v1650_v35 = vld [vmem:[#allocation7 + $0x220] sm:$0xff]  ;;  %v1664_v40 = vld [vmem:[#allocation7 + $0x290] sm:$0xff] }
 0x131   :  { %v1551_v48 = vmul.f32 %v4540_v10, %v332_v34  ;;  %3601 = vmatpush3.msra.mxu0 %v1661_v41  ;;  %v1550_v51 = vmul.f32 %v4540_v10, %v330_v28  ;;  %3639 = vmatpush3.msra.mxu1 %v1693_v43  ;;  %v1553_v54 = vmul.f32 %v4540_v10, %v409_v7  ;;  %v1684_v28 = vld [vmem:[#allocation7 + $0x330] sm:$0xff]  ;;  %v1698_v34 = vld [vmem:[#allocation7 + $0x3a0] sm:$0xff]  ;;  %v1665_v7 = vld [vmem:[#allocation7 + $0x298] sm:$0xff]  ;;  %v484_v41 = vpop.f32.mrf.mxu0 }
 0x132   :  { %3602 = vmatprep.subr.mxu0 %v1676_v44  ;;  %3640 = vmatprep.subr.mxu1 %v1708_v45  ;;  %v1552_v58 = vmul.f32 %v4540_v10, %v407_v29  ;;  %v1667_v29 = vld [vmem:[#allocation7 + $0x2a8] sm:$0xff]  ;;  %v1682_v36 = vld [vmem:[#allocation7 + $0x320] sm:$0xff]  ;;  %v1697_v37 = vld [vmem:[#allocation7 + $0x398] sm:$0xff]  ;;  %v561_v44 = vpop.f32.mrf.mxu1 }
 0x133   :  { %3603 = vmatpush3.msra.mxu0 %v1660_v47  ;;  %3641 = vmatpush3.msra.mxu1 %v1692_v50  ;;  %v1649_v38 = vld [vmem:[#allocation7 + $0x218] sm:$0xff]  ;;  %v1696_v42 = vld [vmem:[#allocation7 + $0x390] sm:$0xff]  ;;  %v1663_v47 = vld [vmem:[#allocation7 + $0x288] sm:$0xff] }
 0x134   :  { %2325 = vmatprep.mubr.f32.mxu0 %v1551_v48  ;;  %3604 = vmatprep.subr.mxu0 %v1675_v52  ;;  %v1681_v39 = vld [vmem:[#allocation7 + $0x318] sm:$0xff]  ;;  %v1648_v43 = vld [vmem:[#allocation7 + $0x210] sm:$0xff]  ;;  %v1695_v48 = vld [vmem:[#allocation7 + $0x388] sm:$0xff]  ;;  %v563_v56 = vpop.f32.mrf.mxu1 }
 0x135   :  { %3642 = vmatprep.subr.mxu1 %v1707_v53  ;;  %2326 = vmatmul.mubr.f32.gmra.mxu0 %v1550_v51  ;;  %v1680_v45 = vld [vmem:[#allocation7 + $0x310] sm:$0xff]  ;;  %v1647_v50 = vld [vmem:[#allocation7 + $0x208] sm:$0xff]  ;;  %v1662_v52 = vld [vmem:[#allocation7 + $0x280] sm:$0xff]  ;;  %v486_v53 = vpop.f32.mrf.mxu0 }
 0x136   :  { %3643 = vmatpush3.msra.mxu1 %v1691_v55  ;;  %3605 = vmatpush3.msra.mxu0 %v1659_v57  ;;  %v1679_v51 = vld [vmem:[#allocation7 + $0x308] sm:$0xff]  ;;  %v1646_v55 = vld [vmem:[#allocation7 + $0x200] sm:$0xff]  ;;  %v1741_v59 = vld [vmem:[#allocation7 + $0x4f8] sm:$0xff] }
 0x137   :  { %2400 = vmatprep.mubr.f32.mxu1 %v1553_v54  ;;  %3606 = vmatprep.subr.mxu0 %v1674_v60  ;;  %v1694_v54 = vld [vmem:[#allocation7 + $0x380] sm:$0xff]  ;;  %v1524_v60 = vmul.f32 %v4530_v32, %v4545_v49  ;;  %v1772_v49 = vld [vmem:[#allocation7 + $0x5f0] sm:$0xff] }
 0x138   :  { %3644 = vmatprep.subr.mxu1 %v1706_v61  ;;  %2401 = vmatmul.mubr.f32.gmra.mxu1 %v1552_v58  ;;  %v1678_v57 = vld [vmem:[#allocation7 + $0x300] sm:$0xff]  ;;  %v1522_v58 = vmul.f32 %v4530_v32, %v4542_v46  ;;  %v1773_v61 = vld [vmem:[#allocation7 + $0x5f8] sm:$0xff] }
 0x139   :  { %3607 = vmatpush3.msra.mxu0 %v1658_v62  ;;  %3645 = vmatpush3.msra.mxu1 %v1690_v1  ;;  %v1555_v62 = vmul.f32 %v4540_v10, %v486_v53  ;;  %v1725_v1 = vld [vmem:[#allocation7 + $0x478] sm:$0xff]  ;;  %v1762_v53 = vld [vmem:[#allocation7 + $0x5a0] sm:$0xff] }
 0x13a   :  { %3608 = vmatprep.subr.mxu0 %v1673_v2  ;;  %2470 = vmatprep.mubr.f32.mxu0 %v1523_v63  ;;  %v4557_v63 = vpop.f32.mrf.mxu0  ;;  %v1557_v2 = vmul.f32 %v4540_v10, %v563_v56  ;;  %v1757_v46 = vld [vmem:[#allocation7 + $0x578] sm:$0xff] }
 0x13b   :  { %3646 = vmatprep.subr.mxu1 %v1705_v4  ;;  %2545 = vmatprep.mubr.f32.mxu1 %v1525_v3  ;;  %v4560_v3 = vpop.f32.mrf.mxu1  ;;  %v1740_v4 = vld [vmem:[#allocation7 + $0x4f0] sm:$0xff]  ;;  %v1729_v56 = vld [vmem:[#allocation7 + $0x498] sm:$0xff] }
 0x13c   :  { %3609 = vmatpush3.msra.mxu0 %v1657_v5  ;;  %3647 = vmatpush3.msra.mxu1 %v1689_v6  ;;  %v1724_v5 = vld [vmem:[#allocation7 + $0x470] sm:$0xff] }
 0x13d   :  { %3610 = vmatprep.subr.mxu0 %v1672_v8  ;;  %3648 = vmatprep.subr.mxu1 %v1704_v9  ;;  %v1756_v6 = vld [vmem:[#allocation7 + $0x570] sm:$0xff]  ;;  %v1554_v8 = vmul.f32 %v4540_v10, %v484_v41  ;;  %v634_v9 = vpop.f32.mrf.mxu0  ;;  %v1749_v41 = vld [vmem:[#allocation7 + $0x538] sm:$0xff] }
 0x13e   :  { %3611 = vmatpush3.msra.mxu0 %v1656_v11  ;;  %3649 = vmatpush3.msra.mxu1 %v1688_v12  ;;  %v1739_v11 = vld [vmem:[#allocation7 + $0x4e8] sm:$0xff]  ;;  %v1556_v12 = vmul.f32 %v4540_v10, %v561_v44  ;;  %v1716_v44 = vld [vmem:[#allocation7 + $0x430] sm:$0xff] }
 0x13f   :  { %3612 = vmatprep.subr.mxu0 %v1671_v0  ;;  %3650 = vmatprep.subr.mxu1 %v1703_v13  ;;  %v711_v0 = vpop.f32.mrf.mxu1  ;;  %v1771_v13 = vld [vmem:[#allocation7 + $0x5e8] sm:$0xff] }
 0x140   :  { %3613 = vmatpush3.msra.mxu0 %v1655_v14  ;;  %3651 = vmatpush3.msra.mxu1 %v1687_v15  ;;  %v1723_v14 = vld [vmem:[#allocation7 + $0x468] sm:$0xff] }
 0x141   :  { %3614 = vmatprep.subr.mxu0 %v1670_v16  ;;  %3652 = vmatprep.subr.mxu1 %v1702_v18  ;;  %v1755_v15 = vld [vmem:[#allocation7 + $0x568] sm:$0xff]  ;;  %v1527_v16 = vmul.f32 %v4530_v32, %v634_v9  ;;  %v1738_v18 = vld [vmem:[#allocation7 + $0x4e0] sm:$0xff] }
 0x142   :  { %3615 = vmatpush3.msra.mxu0 %v1654_v19  ;;  %3653 = vmatpush3.msra.mxu1 %v1686_v20  ;;  %v1529_v19 = vmul.f32 %v4530_v32, %v711_v0  ;;  %v1770_v20 = vld [vmem:[#allocation7 + $0x5e0] sm:$0xff] }
 0x143   :  { %3616 = vmatprep.subr.mxu0 %v1669_v21  ;;  %3654 = vmatprep.subr.mxu1 %v1701_v22  ;;  %v1722_v21 = vld [vmem:[#allocation7 + $0x460] sm:$0xff] }
 0x144   :  { %3617 = vmatpush3.msra.mxu0 %v1653_v23  ;;  %3655 = vmatpush3.msra.mxu1 %v1685_v24  ;;  %v1754_v22 = vld [vmem:[#allocation7 + $0x560] sm:$0xff]  ;;  %v1737_v23 = vld [vmem:[#allocation7 + $0x4d8] sm:$0xff] }
 0x145   :  { %3618 = vmatprep.subr.mxu0 %v1668_v25  ;;  %3656 = vmatprep.subr.mxu1 %v1700_v27  ;;  %v1769_v24 = vld [vmem:[#allocation7 + $0x5d8] sm:$0xff] }
 0x146   :  { %3619 = vmatpush3.msra.mxu0 %v1652_v17  ;;  %3657 = vmatpush3.msra.mxu1 %v1684_v28  ;;  %v1721_v25 = vld [vmem:[#allocation7 + $0x458] sm:$0xff]  ;;  %v1736_v17 = vld [vmem:[#allocation7 + $0x4d0] sm:$0xff] }
 0x147   :  { %3620 = vmatprep.subr.mxu0 %v1667_v29  ;;  %3658 = vmatprep.subr.mxu1 %v1699_v30  ;;  %v1753_v27 = vld [vmem:[#allocation7 + $0x558] sm:$0xff]  ;;  %v1768_v28 = vld [vmem:[#allocation7 + $0x5d0] sm:$0xff] }
 0x148   :  { %3621 = vmatpush3.msra.mxu0 %v1651_v26  ;;  %3659 = vmatpush3.msra.mxu1 %v1683_v31  ;;  %v1720_v29 = vld [vmem:[#allocation7 + $0x450] sm:$0xff]  ;;  %v1735_v26 = vld [vmem:[#allocation7 + $0x4c8] sm:$0xff] }
 0x149   :  { %3622 = vmatprep.subr.mxu0 %v1666_v33  ;;  %3660 = vmatprep.subr.mxu1 %v1698_v34  ;;  %v1752_v30 = vld [vmem:[#allocation7 + $0x550] sm:$0xff]  ;;  %v1767_v31 = vld [vmem:[#allocation7 + $0x5c8] sm:$0xff] }
 0x14a   :  { %3623 = vmatpush3.msra.mxu0 %v1650_v35  ;;  %3661 = vmatpush3.msra.mxu1 %v1682_v36  ;;  %v1719_v33 = vld [vmem:[#allocation7 + $0x448] sm:$0xff]  ;;  %v1734_v35 = vld [vmem:[#allocation7 + $0x4c0] sm:$0xff] }
 0x14b   :  { %3624 = vmatprep.subr.mxu0 %v1665_v7  ;;  %3662 = vmatprep.subr.mxu1 %v1697_v37  ;;  %v1751_v34 = vld [vmem:[#allocation7 + $0x548] sm:$0xff]  ;;  %v1766_v36 = vld [vmem:[#allocation7 + $0x5c0] sm:$0xff] }
 0x14c   :  { %3625 = vmatpush3.msra.mxu0 %v1649_v38  ;;  %3663 = vmatpush3.msra.mxu1 %v1681_v39  ;;  %v1718_v7 = vld [vmem:[#allocation7 + $0x440] sm:$0xff]  ;;  %v1733_v38 = vld [vmem:[#allocation7 + $0x4b8] sm:$0xff] }
 0x14d   :  { %3626 = vmatprep.subr.mxu0 %v1664_v40  ;;  %3664 = vmatprep.subr.mxu1 %v1696_v42  ;;  %v1750_v37 = vld [vmem:[#allocation7 + $0x540] sm:$0xff]  ;;  %v1765_v39 = vld [vmem:[#allocation7 + $0x5b8] sm:$0xff]  ;;  %v1732_v42 = vld [vmem:[#allocation7 + $0x4b0] sm:$0xff] }
 0x14e   :  { %3627 = vmatpush3.msra.mxu0 %v1648_v43  ;;  %3665 = vmatpush3.msra.mxu1 %v1680_v45  ;;  %v1717_v40 = vld [vmem:[#allocation7 + $0x438] sm:$0xff]  ;;  %v1764_v43 = vld [vmem:[#allocation7 + $0x5b0] sm:$0xff] }
 0x14f   :  { %3628 = vmatprep.subr.mxu0 %v1663_v47  ;;  %3666 = vmatprep.subr.mxu1 %v1695_v48  ;;  %v1748_v45 = vld [vmem:[#allocation7 + $0x530] sm:$0xff]  ;;  %v1731_v47 = vld [vmem:[#allocation7 + $0x4a8] sm:$0xff] }
 0x150   :  { %3629 = vmatpush3.msra.mxu0 %v1647_v50  ;;  %3667 = vmatpush3.msra.mxu1 %v1679_v51  ;;  %v1763_v48 = vld [vmem:[#allocation7 + $0x5a8] sm:$0xff] }
 0x151   :  { %3630 = vmatprep.subr.mxu0 %v1662_v52  ;;  %3668 = vmatprep.subr.mxu1 %v1694_v54  ;;  %v1715_v50 = vld [vmem:[#allocation7 + $0x428] sm:$0xff]  ;;  %v1730_v52 = vld [vmem:[#allocation7 + $0x4a0] sm:$0xff] }
 0x152   :  { %3631 = vmatpush3.msra.mxu0 %v1646_v55  ;;  %3669 = vmatpush3.msra.mxu1 %v1678_v57  ;;  %v1747_v51 = vld [vmem:[#allocation7 + $0x528] sm:$0xff]  ;;  %v1714_v54 = vld [vmem:[#allocation7 + $0x420] sm:$0xff]  ;;  %v1761_v57 = vld [vmem:[#allocation7 + $0x598] sm:$0xff] }
 0x153   :  { %2471 = vmatmul.mubr.f32.vlgmr.msra.gmra.mxu0 %v1522_v58  ;;  %2546 = vmatmul.mubr.f32.vlgmr.msra.gmra.mxu1 %v1524_v60  ;;  %v1746_v55 = vld [vmem:[#allocation7 + $0x520] sm:$0xff]  ;;  %v1713_v58 = vld [vmem:[#allocation7 + $0x418] sm:$0xff]  ;;  %v1728_v60 = vld [vmem:[#allocation7 + $0x490] sm:$0xff] }
 0x154   :  { %3676 = vmatprep.subr.mxu0 %v1741_v59  ;;  %3714 = vmatprep.subr.mxu1 %v1773_v61  ;;  %v1745_v59 = vld [vmem:[#allocation7 + $0x518] sm:$0xff]  ;;  %v638_v61 = vpop.f32.mrf.mxu0 }
 0x155   :  { %2475 = vmatprep.mubr.f32.mxu0 %v1555_v62  ;;  %2550 = vmatprep.mubr.f32.mxu1 %v1557_v2  ;;  %v1760_v62 = vld [vmem:[#allocation7 + $0x590] sm:$0xff]  ;;  %v715_v2 = vpop.f32.mrf.mxu1 }
 0x156   :  { %3677 = vmatpush3.msra.mxu0 %v1725_v1  ;;  %3715 = vmatpush3.msra.mxu1 %v1757_v46  ;;  %v1712_v1 = vld [vmem:[#allocation7 + $0x410] sm:$0xff]  ;;  %v640_v9 = vpop.f32.mrf.mxu0 }
 0x157   :  { %3678 = vmatprep.subr.mxu0 %v1740_v4  ;;  %3716 = vmatprep.subr.mxu1 %v1772_v49  ;;  %v1744_v46 = vld [vmem:[#allocation7 + $0x510] sm:$0xff]  ;;  %v1727_v4 = vld [vmem:[#allocation7 + $0x488] sm:$0xff]  ;;  %v717_v0 = vpop.f32.mrf.mxu1 }
 0x158   :  { %3679 = vmatpush3.msra.mxu0 %v1724_v5  ;;  %3717 = vmatpush3.msra.mxu1 %v1756_v6  ;;  %v1759_v49 = vld [vmem:[#allocation7 + $0x588] sm:$0xff] }
 0x159   :  { %2476 = vmatmul.mubr.f32.gmra.mxu0 %v1554_v8  ;;  %2551 = vmatmul.mubr.f32.gmra.mxu1 %v1556_v12  ;;  %v1711_v5 = vld [vmem:[#allocation7 + $0x408] sm:$0xff]  ;;  %v1726_v8 = vld [vmem:[#allocation7 + $0x480] sm:$0xff] }
 0x15a   :  { %3680 = vmatprep.subr.mxu0 %v1739_v11  ;;  %3718 = vmatprep.subr.mxu1 %v1771_v13  ;;  %v1743_v6 = vld [vmem:[#allocation7 + $0x508] sm:$0xff]  ;;  %v1758_v11 = vld [vmem:[#allocation7 + $0x580] sm:$0xff] }
 0x15b   :  { %3681 = vmatpush3.msra.mxu0 %v1723_v14  ;;  %2620 = vmatprep.mubr.f32.mxu0 %v1527_v16  ;;  %v1710_v12 = vld [vmem:[#allocation7 + $0x400] sm:$0xff]  ;;  %v1526_v14 = vmul.f32 %v4530_v32, %v4557_v63  ;;  %v1528_v16 = vmul.f32 %v4530_v32, %v4560_v3  ;;  %v1821_v63 = vld [vmem:[#allocation7 + $0x778] sm:$0xff]  ;;  %v1836_v3 = vld [vmem:[#allocation7 + $0x7f0] sm:$0xff] }
 0x15c   :  { %3719 = vmatpush3.msra.mxu1 %v1755_v15  ;;  %2695 = vmatprep.mubr.f32.mxu1 %v1529_v19  ;;  %v1742_v13 = vld [vmem:[#allocation7 + $0x500] sm:$0xff]  ;;  %v1805_v15 = vld [vmem:[#allocation7 + $0x6f8] sm:$0xff]  ;;  %v1559_v19 = vmul.f32 %v4540_v10, %v640_v9 }
 0x15d   :  { %3682 = vmatprep.subr.mxu0 %v1738_v18  ;;  %3720 = vmatprep.subr.mxu1 %v1770_v20  ;;  %v1837_v18 = vld [vmem:[#allocation7 + $0x7f8] sm:$0xff]  ;;  %v4571_v20 = vpop.f32.mrf.mxu0  ;;  %v1826_v9 = vld [vmem:[#allocation7 + $0x7a0] sm:$0xff] }
 0x15e   :  { %3683 = vmatpush3.msra.mxu0 %v1722_v21  ;;  %3721 = vmatpush3.msra.mxu1 %v1754_v22  ;;  %v1789_v21 = vld [vmem:[#allocation7 + $0x678] sm:$0xff]  ;;  %v1561_v22 = vmul.f32 %v4540_v10, %v717_v0 }
 0x15f   :  { %3684 = vmatprep.subr.mxu0 %v1737_v23  ;;  %3722 = vmatprep.subr.mxu1 %v1769_v24  ;;  %v4574_v23 = vpop.f32.mrf.mxu1  ;;  %v1804_v24 = vld [vmem:[#allocation7 + $0x6f0] sm:$0xff]  ;;  %v1793_v0 = vld [vmem:[#allocation7 + $0x698] sm:$0xff] }
 0x160   :  { %3685 = vmatpush3.msra.mxu0 %v1721_v25  ;;  %3723 = vmatpush3.msra.mxu1 %v1753_v27  ;;  %v1788_v25 = vld [vmem:[#allocation7 + $0x670] sm:$0xff] }
 0x161   :  { %3686 = vmatprep.subr.mxu0 %v1736_v17  ;;  %3724 = vmatprep.subr.mxu1 %v1768_v28  ;;  %v1820_v27 = vld [vmem:[#allocation7 + $0x770] sm:$0xff]  ;;  %v1558_v17 = vmul.f32 %v4540_v10, %v638_v61  ;;  %v788_v28 = vpop.f32.mrf.mxu0  ;;  %v1813_v61 = vld [vmem:[#allocation7 + $0x738] sm:$0xff] }
 0x162   :  { %3687 = vmatpush3.msra.mxu0 %v1720_v29  ;;  %3725 = vmatpush3.msra.mxu1 %v1752_v30  ;;  %v1803_v29 = vld [vmem:[#allocation7 + $0x6e8] sm:$0xff]  ;;  %v1560_v30 = vmul.f32 %v4540_v10, %v715_v2  ;;  %v1780_v2 = vld [vmem:[#allocation7 + $0x630] sm:$0xff] }
 0x163   :  { %3688 = vmatprep.subr.mxu0 %v1735_v26  ;;  %3726 = vmatprep.subr.mxu1 %v1767_v31  ;;  %v865_v26 = vpop.f32.mrf.mxu1  ;;  %v1835_v31 = vld [vmem:[#allocation7 + $0x7e8] sm:$0xff] }
 0x164   :  { %3689 = vmatpush3.msra.mxu0 %v1719_v33  ;;  %3727 = vmatpush3.msra.mxu1 %v1751_v34  ;;  %v1787_v33 = vld [vmem:[#allocation7 + $0x668] sm:$0xff] }
 0x165   :  { %3690 = vmatprep.subr.mxu0 %v1734_v35  ;;  %3728 = vmatprep.subr.mxu1 %v1766_v36  ;;  %v1819_v34 = vld [vmem:[#allocation7 + $0x768] sm:$0xff]  ;;  %v1531_v35 = vmul.f32 %v4530_v32, %v788_v28  ;;  %v1802_v36 = vld [vmem:[#allocation7 + $0x6e0] sm:$0xff] }
 0x166   :  { %3691 = vmatpush3.msra.mxu0 %v1718_v7  ;;  %3729 = vmatpush3.msra.mxu1 %v1750_v37  ;;  %v1533_v7 = vmul.f32 %v4530_v32, %v865_v26  ;;  %v1834_v37 = vld [vmem:[#allocation7 + $0x7e0] sm:$0xff] }
 0x167   :  { %3692 = vmatprep.subr.mxu0 %v1733_v38  ;;  %3730 = vmatprep.subr.mxu1 %v1765_v39  ;;  %v1786_v38 = vld [vmem:[#allocation7 + $0x660] sm:$0xff] }
 0x168   :  { %3693 = vmatpush3.msra.mxu0 %v1717_v40  ;;  %3731 = vmatpush3.msra.mxu1 %v1749_v41  ;;  %v1818_v39 = vld [vmem:[#allocation7 + $0x760] sm:$0xff]  ;;  %v1801_v40 = vld [vmem:[#allocation7 + $0x6d8] sm:$0xff] }
 0x169   :  { %3694 = vmatprep.subr.mxu0 %v1732_v42  ;;  %3732 = vmatprep.subr.mxu1 %v1764_v43  ;;  %v1833_v41 = vld [vmem:[#allocation7 + $0x7d8] sm:$0xff] }
 0x16a   :  { %3695 = vmatpush3.msra.mxu0 %v1716_v44  ;;  %3733 = vmatpush3.msra.mxu1 %v1748_v45  ;;  %v1785_v42 = vld [vmem:[#allocation7 + $0x658] sm:$0xff]  ;;  %v1800_v44 = vld [vmem:[#allocation7 + $0x6d0] sm:$0xff] }
 0x16b   :  { %3696 = vmatprep.subr.mxu0 %v1731_v47  ;;  %3734 = vmatprep.subr.mxu1 %v1763_v48  ;;  %v1817_v43 = vld [vmem:[#allocation7 + $0x758] sm:$0xff]  ;;  %v1832_v45 = vld [vmem:[#allocation7 + $0x7d0] sm:$0xff] }
 0x16c   :  { %3697 = vmatpush3.msra.mxu0 %v1715_v50  ;;  %3735 = vmatpush3.msra.mxu1 %v1747_v51  ;;  %v1784_v47 = vld [vmem:[#allocation7 + $0x650] sm:$0xff]  ;;  %v1799_v50 = vld [vmem:[#allocation7 + $0x6c8] sm:$0xff] }
 0x16d   :  { %3698 = vmatprep.subr.mxu0 %v1730_v52  ;;  %3736 = vmatprep.subr.mxu1 %v1762_v53  ;;  %v1816_v48 = vld [vmem:[#allocation7 + $0x750] sm:$0xff]  ;;  %v1831_v51 = vld [vmem:[#allocation7 + $0x7c8] sm:$0xff] }
 0x16e   :  { %3699 = vmatpush3.msra.mxu0 %v1714_v54  ;;  %3737 = vmatpush3.msra.mxu1 %v1746_v55  ;;  %v1783_v52 = vld [vmem:[#allocation7 + $0x648] sm:$0xff]  ;;  %v1798_v54 = vld [vmem:[#allocation7 + $0x6c0] sm:$0xff] }
 0x16f   :  { %3700 = vmatprep.subr.mxu0 %v1729_v56  ;;  %3738 = vmatprep.subr.mxu1 %v1761_v57  ;;  %v1815_v53 = vld [vmem:[#allocation7 + $0x748] sm:$0xff]  ;;  %v1830_v55 = vld [vmem:[#allocation7 + $0x7c0] sm:$0xff] }
 0x170   :  { %3701 = vmatpush3.msra.mxu0 %v1713_v58  ;;  %3739 = vmatpush3.msra.mxu1 %v1745_v59  ;;  %v1782_v56 = vld [vmem:[#allocation7 + $0x640] sm:$0xff]  ;;  %v1797_v58 = vld [vmem:[#allocation7 + $0x6b8] sm:$0xff] }
 0x171   :  { %3702 = vmatprep.subr.mxu0 %v1728_v60  ;;  %3740 = vmatprep.subr.mxu1 %v1760_v62  ;;  %v1814_v57 = vld [vmem:[#allocation7 + $0x740] sm:$0xff]  ;;  %v1829_v59 = vld [vmem:[#allocation7 + $0x7b8] sm:$0xff]  ;;  %v1796_v62 = vld [vmem:[#allocation7 + $0x6b0] sm:$0xff] }
 0x172   :  { %3703 = vmatpush3.msra.mxu0 %v1712_v1  ;;  %3741 = vmatpush3.msra.mxu1 %v1744_v46  ;;  %v1781_v60 = vld [vmem:[#allocation7 + $0x638] sm:$0xff]  ;;  %v1828_v1 = vld [vmem:[#allocation7 + $0x7b0] sm:$0xff] }
 0x173   :  { %3704 = vmatprep.subr.mxu0 %v1727_v4  ;;  %3742 = vmatprep.subr.mxu1 %v1759_v49  ;;  %v1812_v46 = vld [vmem:[#allocation7 + $0x730] sm:$0xff]  ;;  %v1795_v4 = vld [vmem:[#allocation7 + $0x6a8] sm:$0xff] }
 0x174   :  { %3705 = vmatpush3.msra.mxu0 %v1711_v5  ;;  %3743 = vmatpush3.msra.mxu1 %v1743_v6  ;;  %v1827_v49 = vld [vmem:[#allocation7 + $0x7a8] sm:$0xff] }
 0x175   :  { %3706 = vmatprep.subr.mxu0 %v1726_v8  ;;  %3744 = vmatprep.subr.mxu1 %v1758_v11  ;;  %v1779_v5 = vld [vmem:[#allocation7 + $0x628] sm:$0xff]  ;;  %v1794_v8 = vld [vmem:[#allocation7 + $0x6a0] sm:$0xff] }
 0x176   :  { %3707 = vmatpush3.msra.mxu0 %v1710_v12  ;;  %3745 = vmatpush3.msra.mxu1 %v1742_v13  ;;  %v1811_v6 = vld [vmem:[#allocation7 + $0x728] sm:$0xff]  ;;  %v1778_v11 = vld [vmem:[#allocation7 + $0x620] sm:$0xff]  ;;  %v1825_v13 = vld [vmem:[#allocation7 + $0x798] sm:$0xff] }
 0x177   :  { %2621 = vmatmul.mubr.f32.vlgmr.msra.gmra.mxu0 %v1526_v14  ;;  %2696 = vmatmul.mubr.f32.vlgmr.msra.gmra.mxu1 %v1528_v16  ;;  %v1810_v12 = vld [vmem:[#allocation7 + $0x720] sm:$0xff]  ;;  %v1777_v14 = vld [vmem:[#allocation7 + $0x618] sm:$0xff]  ;;  %v1792_v16 = vld [vmem:[#allocation7 + $0x690] sm:$0xff] }
 0x178   :  { %3752 = vmatprep.subr.mxu0 %v1805_v15  ;;  %3790 = vmatprep.subr.mxu1 %v1837_v18  ;;  %v1809_v15 = vld [vmem:[#allocation7 + $0x718] sm:$0xff]  ;;  %v792_v18 = vpop.f32.mrf.mxu0 }
 0x179   :  { %2625 = vmatprep.mubr.f32.mxu0 %v1559_v19  ;;  %2700 = vmatprep.mubr.f32.mxu1 %v1561_v22  ;;  %v1824_v19 = vld [vmem:[#allocation7 + $0x790] sm:$0xff]  ;;  %v869_v22 = vpop.f32.mrf.mxu1 }
 0x17a   :  { %3753 = vmatpush3.msra.mxu0 %v1789_v21  ;;  %3791 = vmatpush3.msra.mxu1 %v1821_v63  ;;  %v1776_v21 = vld [vmem:[#allocation7 + $0x610] sm:$0xff]  ;;  %v794_v28 = vpop.f32.mrf.mxu0 }
 0x17b   :  { %3754 = vmatprep.subr.mxu0 %v1804_v24  ;;  %3792 = vmatprep.subr.mxu1 %v1836_v3  ;;  %v1808_v63 = vld [vmem:[#allocation7 + $0x710] sm:$0xff]  ;;  %v1791_v24 = vld [vmem:[#allocation7 + $0x688] sm:$0xff]  ;;  %v871_v26 = vpop.f32.mrf.mxu1 }
 0x17c   :  { %3755 = vmatpush3.msra.mxu0 %v1788_v25  ;;  %3793 = vmatpush3.msra.mxu1 %v1820_v27  ;;  %v1823_v3 = vld [vmem:[#allocation7 + $0x788] sm:$0xff] }
 0x17d   :  { %2626 = vmatmul.mubr.f32.gmra.mxu0 %v1558_v17  ;;  %2701 = vmatmul.mubr.f32.gmra.mxu1 %v1560_v30  ;;  %v1775_v25 = vld [vmem:[#allocation7 + $0x608] sm:$0xff]  ;;  %v1790_v17 = vld [vmem:[#allocation7 + $0x680] sm:$0xff] }
 0x17e   :  { %3756 = vmatprep.subr.mxu0 %v1803_v29  ;;  %3794 = vmatprep.subr.mxu1 %v1835_v31  ;;  %v1807_v27 = vld [vmem:[#allocation7 + $0x708] sm:$0xff]  ;;  %v1822_v29 = vld [vmem:[#allocation7 + $0x780] sm:$0xff] }
 0x17f   :  { %3757 = vmatpush3.msra.mxu0 %v1787_v33  ;;  %2770 = vmatprep.mubr.f32.mxu0 %v1531_v35  ;;  %v1774_v30 = vld [vmem:[#allocation7 + $0x600] sm:$0xff]  ;;  %v1530_v33 = vmul.f32 %v4530_v32, %v4571_v20  ;;  %v1532_v35 = vmul.f32 %v4530_v32, %v4574_v23  ;;  %v1885_v20 = vld [vmem:[#allocation7 + $0x978] sm:$0xff]  ;;  %v1900_v23 = vld [vmem:[#allocation7 + $0x9f0] sm:$0xff] }
 0x180   :  { %3795 = vmatpush3.msra.mxu1 %v1819_v34  ;;  %2845 = vmatprep.mubr.f32.mxu1 %v1533_v7  ;;  %v1806_v31 = vld [vmem:[#allocation7 + $0x700] sm:$0xff]  ;;  %v1869_v34 = vld [vmem:[#allocation7 + $0x8f8] sm:$0xff]  ;;  %v1563_v7 = vmul.f32 %v4540_v10, %v794_v28 }
 0x181   :  { %3758 = vmatprep.subr.mxu0 %v1802_v36  ;;  %3796 = vmatprep.subr.mxu1 %v1834_v37  ;;  %v1901_v36 = vld [vmem:[#allocation7 + $0x9f8] sm:$0xff]  ;;  %v4585_v37 = vpop.f32.mrf.mxu0  ;;  %v1890_v28 = vld [vmem:[#allocation7 + $0x9a0] sm:$0xff] }
 0x182   :  { %3759 = vmatpush3.msra.mxu0 %v1786_v38  ;;  %3797 = vmatpush3.msra.mxu1 %v1818_v39  ;;  %v1853_v38 = vld [vmem:[#allocation7 + $0x878] sm:$0xff]  ;;  %v1565_v39 = vmul.f32 %v4540_v10, %v871_v26 }
 0x183   :  { %3760 = vmatprep.subr.mxu0 %v1801_v40  ;;  %3798 = vmatprep.subr.mxu1 %v1833_v41  ;;  %v4588_v40 = vpop.f32.mrf.mxu1  ;;  %v1868_v41 = vld [vmem:[#allocation7 + $0x8f0] sm:$0xff]  ;;  %v1857_v26 = vld [vmem:[#allocation7 + $0x898] sm:$0xff] }
 0x184   :  { %3761 = vmatpush3.msra.mxu0 %v1785_v42  ;;  %3799 = vmatpush3.msra.mxu1 %v1817_v43  ;;  %v1852_v42 = vld [vmem:[#allocation7 + $0x870] sm:$0xff] }
 0x185   :  { %3762 = vmatprep.subr.mxu0 %v1800_v44  ;;  %3800 = vmatprep.subr.mxu1 %v1832_v45  ;;  %v1884_v43 = vld [vmem:[#allocation7 + $0x970] sm:$0xff]  ;;  %v1562_v44 = vmul.f32 %v4540_v10, %v792_v18  ;;  %v942_v45 = vpop.f32.mrf.mxu0  ;;  %v1877_v18 = vld [vmem:[#allocation7 + $0x938] sm:$0xff] }
 0x186   :  { %3763 = vmatpush3.msra.mxu0 %v1784_v47  ;;  %3801 = vmatpush3.msra.mxu1 %v1816_v48  ;;  %v1867_v47 = vld [vmem:[#allocation7 + $0x8e8] sm:$0xff]  ;;  %v1564_v48 = vmul.f32 %v4540_v10, %v869_v22  ;;  %v1844_v22 = vld [vmem:[#allocation7 + $0x830] sm:$0xff] }
 0x187   :  { %3764 = vmatprep.subr.mxu0 %v1799_v50  ;;  %3802 = vmatprep.subr.mxu1 %v1831_v51  ;;  %v1019_v50 = vpop.f32.mrf.mxu1  ;;  %v1899_v51 = vld [vmem:[#allocation7 + $0x9e8] sm:$0xff] }
 0x188   :  { %3765 = vmatpush3.msra.mxu0 %v1783_v52  ;;  %3803 = vmatpush3.msra.mxu1 %v1815_v53  ;;  %v1851_v52 = vld [vmem:[#allocation7 + $0x868] sm:$0xff] }
 0x189   :  { %3766 = vmatprep.subr.mxu0 %v1798_v54  ;;  %3804 = vmatprep.subr.mxu1 %v1830_v55  ;;  %v1883_v53 = vld [vmem:[#allocation7 + $0x968] sm:$0xff]  ;;  %v1535_v54 = vmul.f32 %v4530_v32, %v942_v45  ;;  %v1866_v55 = vld [vmem:[#allocation7 + $0x8e0] sm:$0xff] }
 0x18a   :  { %3767 = vmatpush3.msra.mxu0 %v1782_v56  ;;  %3805 = vmatpush3.msra.mxu1 %v1814_v57  ;;  %v1537_v56 = vmul.f32 %v4530_v32, %v1019_v50  ;;  %v1898_v57 = vld [vmem:[#allocation7 + $0x9e0] sm:$0xff] }
 0x18b   :  { %3768 = vmatprep.subr.mxu0 %v1797_v58  ;;  %3806 = vmatprep.subr.mxu1 %v1829_v59  ;;  %v1850_v58 = vld [vmem:[#allocation7 + $0x860] sm:$0xff] }
 0x18c   :  { %3769 = vmatpush3.msra.mxu0 %v1781_v60  ;;  %3807 = vmatpush3.msra.mxu1 %v1813_v61  ;;  %v1882_v59 = vld [vmem:[#allocation7 + $0x960] sm:$0xff]  ;;  %v1865_v60 = vld [vmem:[#allocation7 + $0x8d8] sm:$0xff] }
 0x18d   :  { %3770 = vmatprep.subr.mxu0 %v1796_v62  ;;  %3808 = vmatprep.subr.mxu1 %v1828_v1  ;;  %v1897_v61 = vld [vmem:[#allocation7 + $0x9d8] sm:$0xff] }
 0x18e   :  { %3771 = vmatpush3.msra.mxu0 %v1780_v2  ;;  %3809 = vmatpush3.msra.mxu1 %v1812_v46  ;;  %v1849_v62 = vld [vmem:[#allocation7 + $0x858] sm:$0xff]  ;;  %v1864_v2 = vld [vmem:[#allocation7 + $0x8d0] sm:$0xff] }
 0x18f   :  { %3772 = vmatprep.subr.mxu0 %v1795_v4  ;;  %3810 = vmatprep.subr.mxu1 %v1827_v49  ;;  %v1881_v1 = vld [vmem:[#allocation7 + $0x958] sm:$0xff]  ;;  %v1896_v46 = vld [vmem:[#allocation7 + $0x9d0] sm:$0xff] }
 0x190   :  { %3773 = vmatpush3.msra.mxu0 %v1779_v5  ;;  %3811 = vmatpush3.msra.mxu1 %v1811_v6  ;;  %v1848_v4 = vld [vmem:[#allocation7 + $0x850] sm:$0xff]  ;;  %v1863_v5 = vld [vmem:[#allocation7 + $0x8c8] sm:$0xff] }
 0x191   :  { %3774 = vmatprep.subr.mxu0 %v1794_v8  ;;  %3812 = vmatprep.subr.mxu1 %v1826_v9  ;;  %v1880_v49 = vld [vmem:[#allocation7 + $0x950] sm:$0xff]  ;;  %v1895_v6 = vld [vmem:[#allocation7 + $0x9c8] sm:$0xff] }
 0x192   :  { %3775 = vmatpush3.msra.mxu0 %v1778_v11  ;;  %3813 = vmatpush3.msra.mxu1 %v1810_v12  ;;  %v1847_v8 = vld [vmem:[#allocation7 + $0x848] sm:$0xff]  ;;  %v1862_v11 = vld [vmem:[#allocation7 + $0x8c0] sm:$0xff] }
 0x193   :  { %3776 = vmatprep.subr.mxu0 %v1793_v0  ;;  %3814 = vmatprep.subr.mxu1 %v1825_v13  ;;  %v1879_v9 = vld [vmem:[#allocation7 + $0x948] sm:$0xff]  ;;  %v1894_v12 = vld [vmem:[#allocation7 + $0x9c0] sm:$0xff] }
 0x194   :  { %3777 = vmatpush3.msra.mxu0 %v1777_v14  ;;  %3815 = vmatpush3.msra.mxu1 %v1809_v15  ;;  %v1846_v0 = vld [vmem:[#allocation7 + $0x840] sm:$0xff]  ;;  %v1861_v14 = vld [vmem:[#allocation7 + $0x8b8] sm:$0xff] }
 0x195   :  { %3778 = vmatprep.subr.mxu0 %v1792_v16  ;;  %3816 = vmatprep.subr.mxu1 %v1824_v19  ;;  %v1878_v13 = vld [vmem:[#allocation7 + $0x940] sm:$0xff]  ;;  %v1893_v15 = vld [vmem:[#allocation7 + $0x9b8] sm:$0xff]  ;;  %v1860_v19 = vld [vmem:[#allocation7 + $0x8b0] sm:$0xff] }
 0x196   :  { %3779 = vmatpush3.msra.mxu0 %v1776_v21  ;;  %3817 = vmatpush3.msra.mxu1 %v1808_v63  ;;  %v1845_v16 = vld [vmem:[#allocation7 + $0x838] sm:$0xff]  ;;  %v1892_v21 = vld [vmem:[#allocation7 + $0x9b0] sm:$0xff] }
 0x197   :  { %3780 = vmatprep.subr.mxu0 %v1791_v24  ;;  %3818 = vmatprep.subr.mxu1 %v1823_v3  ;;  %v1876_v63 = vld [vmem:[#allocation7 + $0x930] sm:$0xff]  ;;  %v1859_v24 = vld [vmem:[#allocation7 + $0x8a8] sm:$0xff] }
 0x198   :  { %3781 = vmatpush3.msra.mxu0 %v1775_v25  ;;  %3819 = vmatpush3.msra.mxu1 %v1807_v27  ;;  %v1891_v3 = vld [vmem:[#allocation7 + $0x9a8] sm:$0xff] }
 0x199   :  { %3782 = vmatprep.subr.mxu0 %v1790_v17  ;;  %3820 = vmatprep.subr.mxu1 %v1822_v29  ;;  %v1843_v25 = vld [vmem:[#allocation7 + $0x828] sm:$0xff]  ;;  %v1858_v17 = vld [vmem:[#allocation7 + $0x8a0] sm:$0xff] }
 0x19a   :  { %3783 = vmatpush3.msra.mxu0 %v1774_v30  ;;  %3821 = vmatpush3.msra.mxu1 %v1806_v31  ;;  %v1875_v27 = vld [vmem:[#allocation7 + $0x928] sm:$0xff]  ;;  %v1842_v29 = vld [vmem:[#allocation7 + $0x820] sm:$0xff]  ;;  %v1889_v31 = vld [vmem:[#allocation7 + $0x998] sm:$0xff] }
 0x19b   :  { %2771 = vmatmul.mubr.f32.vlgmr.msra.gmra.mxu0 %v1530_v33  ;;  %2846 = vmatmul.mubr.f32.vlgmr.msra.gmra.mxu1 %v1532_v35  ;;  %v1874_v30 = vld [vmem:[#allocation7 + $0x920] sm:$0xff]  ;;  %v1841_v33 = vld [vmem:[#allocation7 + $0x818] sm:$0xff]  ;;  %v1856_v35 = vld [vmem:[#allocation7 + $0x890] sm:$0xff] }
 0x19c   :  { %3828 = vmatprep.subr.mxu0 %v1869_v34  ;;  %3866 = vmatprep.subr.mxu1 %v1901_v36  ;;  %v1873_v34 = vld [vmem:[#allocation7 + $0x918] sm:$0xff]  ;;  %v946_v36 = vpop.f32.mrf.mxu0 }
 0x19d   :  { %2775 = vmatprep.mubr.f32.mxu0 %v1563_v7  ;;  %2850 = vmatprep.mubr.f32.mxu1 %v1565_v39  ;;  %v1888_v7 = vld [vmem:[#allocation7 + $0x990] sm:$0xff]  ;;  %v1023_v39 = vpop.f32.mrf.mxu1 }
 0x19e   :  { %3829 = vmatpush3.msra.mxu0 %v1853_v38  ;;  %3867 = vmatpush3.msra.mxu1 %v1885_v20  ;;  %v1840_v38 = vld [vmem:[#allocation7 + $0x810] sm:$0xff]  ;;  %v948_v45 = vpop.f32.mrf.mxu0 }
 0x19f   :  { %3830 = vmatprep.subr.mxu0 %v1868_v41  ;;  %3868 = vmatprep.subr.mxu1 %v1900_v23  ;;  %v1872_v20 = vld [vmem:[#allocation7 + $0x910] sm:$0xff]  ;;  %v1855_v41 = vld [vmem:[#allocation7 + $0x888] sm:$0xff]  ;;  %v1025_v50 = vpop.f32.mrf.mxu1 }
 0x1a0   :  { %3831 = vmatpush3.msra.mxu0 %v1852_v42  ;;  %3869 = vmatpush3.msra.mxu1 %v1884_v43  ;;  %v1887_v23 = vld [vmem:[#allocation7 + $0x988] sm:$0xff] }
 0x1a1   :  { %2776 = vmatmul.mubr.f32.gmra.mxu0 %v1562_v44  ;;  %2851 = vmatmul.mubr.f32.gmra.mxu1 %v1564_v48  ;;  %v1839_v42 = vld [vmem:[#allocation7 + $0x808] sm:$0xff]  ;;  %v1854_v44 = vld [vmem:[#allocation7 + $0x880] sm:$0xff] }
 0x1a2   :  { %3832 = vmatprep.subr.mxu0 %v1867_v47  ;;  %3870 = vmatprep.subr.mxu1 %v1899_v51  ;;  %v1871_v43 = vld [vmem:[#allocation7 + $0x908] sm:$0xff]  ;;  %v1886_v47 = vld [vmem:[#allocation7 + $0x980] sm:$0xff] }
 0x1a3   :  { %3833 = vmatpush3.msra.mxu0 %v1851_v52  ;;  %2920 = vmatprep.mubr.f32.mxu0 %v1535_v54  ;;  %v1838_v48 = vld [vmem:[#allocation7 + $0x800] sm:$0xff]  ;;  %v1534_v52 = vmul.f32 %v4530_v32, %v4585_v37  ;;  %v1536_v54 = vmul.f32 %v4530_v32, %v4588_v40  ;;  %v1949_v37 = vld [vmem:[#allocation7 + $0xb78] sm:$0xff]  ;;  %v1964_v40 = vld [vmem:[#allocation7 + $0xbf0] sm:$0xff] }
 0x1a4   :  { %3871 = vmatpush3.msra.mxu1 %v1883_v53  ;;  %2995 = vmatprep.mubr.f32.mxu1 %v1537_v56  ;;  %v1870_v51 = vld [vmem:[#allocation7 + $0x900] sm:$0xff]  ;;  %v1933_v53 = vld [vmem:[#allocation7 + $0xaf8] sm:$0xff]  ;;  %v1567_v56 = vmul.f32 %v4540_v10, %v948_v45 }
 0x1a5   :  { %3834 = vmatprep.subr.mxu0 %v1866_v55  ;;  %3872 = vmatprep.subr.mxu1 %v1898_v57  ;;  %v1965_v55 = vld [vmem:[#allocation7 + $0xbf8] sm:$0xff]  ;;  %v4599_v57 = vpop.f32.mrf.mxu0  ;;  %v1954_v45 = vld [vmem:[#allocation7 + $0xba0] sm:$0xff] }
 0x1a6   :  { %3835 = vmatpush3.msra.mxu0 %v1850_v58  ;;  %3873 = vmatpush3.msra.mxu1 %v1882_v59  ;;  %v1917_v58 = vld [vmem:[#allocation7 + $0xa78] sm:$0xff]  ;;  %v1569_v59 = vmul.f32 %v4540_v10, %v1025_v50 }
 0x1a7   :  { %3836 = vmatprep.subr.mxu0 %v1865_v60  ;;  %3874 = vmatprep.subr.mxu1 %v1897_v61  ;;  %v4602_v60 = vpop.f32.mrf.mxu1  ;;  %v1932_v61 = vld [vmem:[#allocation7 + $0xaf0] sm:$0xff]  ;;  %v1921_v50 = vld [vmem:[#allocation7 + $0xa98] sm:$0xff] }
 0x1a8   :  { %3837 = vmatpush3.msra.mxu0 %v1849_v62  ;;  %3875 = vmatpush3.msra.mxu1 %v1881_v1  ;;  %v1916_v62 = vld [vmem:[#allocation7 + $0xa70] sm:$0xff] }
 0x1a9   :  { %3838 = vmatprep.subr.mxu0 %v1864_v2  ;;  %3876 = vmatprep.subr.mxu1 %v1896_v46  ;;  %v1948_v1 = vld [vmem:[#allocation7 + $0xb70] sm:$0xff]  ;;  %v1566_v2 = vmul.f32 %v4540_v10, %v946_v36  ;;  %v1096_v46 = vpop.f32.mrf.mxu0  ;;  %v1941_v36 = vld [vmem:[#allocation7 + $0xb38] sm:$0xff] }
 0x1aa   :  { %3839 = vmatpush3.msra.mxu0 %v1848_v4  ;;  %3877 = vmatpush3.msra.mxu1 %v1880_v49  ;;  %v1931_v4 = vld [vmem:[#allocation7 + $0xae8] sm:$0xff]  ;;  %v1568_v49 = vmul.f32 %v4540_v10, %v1023_v39  ;;  %v1908_v39 = vld [vmem:[#allocation7 + $0xa30] sm:$0xff] }
 0x1ab   :  { %3840 = vmatprep.subr.mxu0 %v1863_v5  ;;  %3878 = vmatprep.subr.mxu1 %v1895_v6  ;;  %v1173_v5 = vpop.f32.mrf.mxu1  ;;  %v1963_v6 = vld [vmem:[#allocation7 + $0xbe8] sm:$0xff] }
 0x1ac   :  { %3841 = vmatpush3.msra.mxu0 %v1847_v8  ;;  %3879 = vmatpush3.msra.mxu1 %v1879_v9  ;;  %v1915_v8 = vld [vmem:[#allocation7 + $0xa68] sm:$0xff] }
 0x1ad   :  { %3842 = vmatprep.subr.mxu0 %v1862_v11  ;;  %3880 = vmatprep.subr.mxu1 %v1894_v12  ;;  %v1947_v9 = vld [vmem:[#allocation7 + $0xb68] sm:$0xff]  ;;  %v1539_v11 = vmul.f32 %v4530_v32, %v1096_v46  ;;  %v1930_v12 = vld [vmem:[#allocation7 + $0xae0] sm:$0xff] }
 0x1ae   :  { %3843 = vmatpush3.msra.mxu0 %v1846_v0  ;;  %3881 = vmatpush3.msra.mxu1 %v1878_v13  ;;  %v1541_v0 = vmul.f32 %v4530_v32, %v1173_v5  ;;  %v1962_v13 = vld [vmem:[#allocation7 + $0xbe0] sm:$0xff] }
 0x1af   :  { %3844 = vmatprep.subr.mxu0 %v1861_v14  ;;  %3882 = vmatprep.subr.mxu1 %v1893_v15  ;;  %v1914_v14 = vld [vmem:[#allocation7 + $0xa60] sm:$0xff] }
 0x1b0   :  { %3845 = vmatpush3.msra.mxu0 %v1845_v16  ;;  %3883 = vmatpush3.msra.mxu1 %v1877_v18  ;;  %v1946_v15 = vld [vmem:[#allocation7 + $0xb60] sm:$0xff]  ;;  %v1929_v16 = vld [vmem:[#allocation7 + $0xad8] sm:$0xff] }
 0x1b1   :  { %3846 = vmatprep.subr.mxu0 %v1860_v19  ;;  %3884 = vmatprep.subr.mxu1 %v1892_v21  ;;  %v1961_v18 = vld [vmem:[#allocation7 + $0xbd8] sm:$0xff] }
 0x1b2   :  { %3847 = vmatpush3.msra.mxu0 %v1844_v22  ;;  %3885 = vmatpush3.msra.mxu1 %v1876_v63  ;;  %v1913_v19 = vld [vmem:[#allocation7 + $0xa58] sm:$0xff]  ;;  %v1928_v22 = vld [vmem:[#allocation7 + $0xad0] sm:$0xff] }
 0x1b3   :  { %3848 = vmatprep.subr.mxu0 %v1859_v24  ;;  %3886 = vmatprep.subr.mxu1 %v1891_v3  ;;  %v1945_v21 = vld [vmem:[#allocation7 + $0xb58] sm:$0xff]  ;;  %v1960_v63 = vld [vmem:[#allocation7 + $0xbd0] sm:$0xff] }
 0x1b4   :  { %3849 = vmatpush3.msra.mxu0 %v1843_v25  ;;  %3887 = vmatpush3.msra.mxu1 %v1875_v27  ;;  %v1912_v24 = vld [vmem:[#allocation7 + $0xa50] sm:$0xff]  ;;  %v1927_v25 = vld [vmem:[#allocation7 + $0xac8] sm:$0xff] }
 0x1b5   :  { %3850 = vmatprep.subr.mxu0 %v1858_v17  ;;  %3888 = vmatprep.subr.mxu1 %v1890_v28  ;;  %v1944_v3 = vld [vmem:[#allocation7 + $0xb50] sm:$0xff]  ;;  %v1959_v27 = vld [vmem:[#allocation7 + $0xbc8] sm:$0xff] }
 0x1b6   :  { %3851 = vmatpush3.msra.mxu0 %v1842_v29  ;;  %3889 = vmatpush3.msra.mxu1 %v1874_v30  ;;  %v1911_v17 = vld [vmem:[#allocation7 + $0xa48] sm:$0xff]  ;;  %v1926_v29 = vld [vmem:[#allocation7 + $0xac0] sm:$0xff] }
 0x1b7   :  { %3852 = vmatprep.subr.mxu0 %v1857_v26  ;;  %3890 = vmatprep.subr.mxu1 %v1889_v31  ;;  %v1943_v28 = vld [vmem:[#allocation7 + $0xb48] sm:$0xff]  ;;  %v1958_v30 = vld [vmem:[#allocation7 + $0xbc0] sm:$0xff] }
 0x1b8   :  { %3853 = vmatpush3.msra.mxu0 %v1841_v33  ;;  %3891 = vmatpush3.msra.mxu1 %v1873_v34  ;;  %v1910_v26 = vld [vmem:[#allocation7 + $0xa40] sm:$0xff]  ;;  %v1925_v33 = vld [vmem:[#allocation7 + $0xab8] sm:$0xff] }
 0x1b9   :  { %3854 = vmatprep.subr.mxu0 %v1856_v35  ;;  %3892 = vmatprep.subr.mxu1 %v1888_v7  ;;  %v1942_v31 = vld [vmem:[#allocation7 + $0xb40] sm:$0xff]  ;;  %v1957_v34 = vld [vmem:[#allocation7 + $0xbb8] sm:$0xff]  ;;  %v1924_v7 = vld [vmem:[#allocation7 + $0xab0] sm:$0xff] }
 0x1ba   :  { %3855 = vmatpush3.msra.mxu0 %v1840_v38  ;;  %3893 = vmatpush3.msra.mxu1 %v1872_v20  ;;  %v1909_v35 = vld [vmem:[#allocation7 + $0xa38] sm:$0xff]  ;;  %v1956_v38 = vld [vmem:[#allocation7 + $0xbb0] sm:$0xff] }
 0x1bb   :  { %3856 = vmatprep.subr.mxu0 %v1855_v41  ;;  %3894 = vmatprep.subr.mxu1 %v1887_v23  ;;  %v1940_v20 = vld [vmem:[#allocation7 + $0xb30] sm:$0xff]  ;;  %v1923_v41 = vld [vmem:[#allocation7 + $0xaa8] sm:$0xff] }
 0x1bc   :  { %3857 = vmatpush3.msra.mxu0 %v1839_v42  ;;  %3895 = vmatpush3.msra.mxu1 %v1871_v43  ;;  %v1955_v23 = vld [vmem:[#allocation7 + $0xba8] sm:$0xff] }
 0x1bd   :  { %3858 = vmatprep.subr.mxu0 %v1854_v44  ;;  %3896 = vmatprep.subr.mxu1 %v1886_v47  ;;  %v1907_v42 = vld [vmem:[#allocation7 + $0xa28] sm:$0xff]  ;;  %v1922_v44 = vld [vmem:[#allocation7 + $0xaa0] sm:$0xff] }
 0x1be   :  { %3859 = vmatpush3.msra.mxu0 %v1838_v48  ;;  %3897 = vmatpush3.msra.mxu1 %v1870_v51  ;;  %v1939_v43 = vld [vmem:[#allocation7 + $0xb28] sm:$0xff]  ;;  %v1906_v47 = vld [vmem:[#allocation7 + $0xa20] sm:$0xff]  ;;  %v1953_v51 = vld [vmem:[#allocation7 + $0xb98] sm:$0xff] }
 0x1bf   :  { %2921 = vmatmul.mubr.f32.vlgmr.msra.gmra.mxu0 %v1534_v52  ;;  %2996 = vmatmul.mubr.f32.vlgmr.msra.gmra.mxu1 %v1536_v54  ;;  %v1938_v48 = vld [vmem:[#allocation7 + $0xb20] sm:$0xff]  ;;  %v1905_v52 = vld [vmem:[#allocation7 + $0xa18] sm:$0xff]  ;;  %v1920_v54 = vld [vmem:[#allocation7 + $0xa90] sm:$0xff] }
 0x1c0   :  { %3904 = vmatprep.subr.mxu0 %v1933_v53  ;;  %3942 = vmatprep.subr.mxu1 %v1965_v55  ;;  %v1937_v53 = vld [vmem:[#allocation7 + $0xb18] sm:$0xff]  ;;  %v1100_v55 = vpop.f32.mrf.mxu0 }
 0x1c1   :  { %2925 = vmatprep.mubr.f32.mxu0 %v1567_v56  ;;  %3000 = vmatprep.mubr.f32.mxu1 %v1569_v59  ;;  %v1952_v56 = vld [vmem:[#allocation7 + $0xb90] sm:$0xff]  ;;  %v1177_v59 = vpop.f32.mrf.mxu1 }
 0x1c2   :  { %3905 = vmatpush3.msra.mxu0 %v1917_v58  ;;  %3943 = vmatpush3.msra.mxu1 %v1949_v37  ;;  %v1904_v58 = vld [vmem:[#allocation7 + $0xa10] sm:$0xff]  ;;  %v1102_v46 = vpop.f32.mrf.mxu0 }
 0x1c3   :  { %3906 = vmatprep.subr.mxu0 %v1932_v61  ;;  %3944 = vmatprep.subr.mxu1 %v1964_v40  ;;  %v1936_v37 = vld [vmem:[#allocation7 + $0xb10] sm:$0xff]  ;;  %v1919_v61 = vld [vmem:[#allocation7 + $0xa88] sm:$0xff]  ;;  %v1179_v5 = vpop.f32.mrf.mxu1 }
 0x1c4   :  { %3907 = vmatpush3.msra.mxu0 %v1916_v62  ;;  %3945 = vmatpush3.msra.mxu1 %v1948_v1  ;;  %v1951_v40 = vld [vmem:[#allocation7 + $0xb88] sm:$0xff] }
 0x1c5   :  { %2926 = vmatmul.mubr.f32.gmra.mxu0 %v1566_v2  ;;  %3001 = vmatmul.mubr.f32.gmra.mxu1 %v1568_v49  ;;  %v1903_v62 = vld [vmem:[#allocation7 + $0xa08] sm:$0xff]  ;;  %v1918_v2 = vld [vmem:[#allocation7 + $0xa80] sm:$0xff] }
 0x1c6   :  { %3908 = vmatprep.subr.mxu0 %v1931_v4  ;;  %3946 = vmatprep.subr.mxu1 %v1963_v6  ;;  %v1935_v1 = vld [vmem:[#allocation7 + $0xb08] sm:$0xff]  ;;  %v1950_v4 = vld [vmem:[#allocation7 + $0xb80] sm:$0xff] }
 0x1c7   :  { %3909 = vmatpush3.msra.mxu0 %v1915_v8  ;;  %3070 = vmatprep.mubr.f32.mxu0 %v1539_v11  ;;  %v1902_v49 = vld [vmem:[#allocation7 + $0xa00] sm:$0xff]  ;;  %v1538_v8 = vmul.f32 %v4530_v32, %v4599_v57  ;;  %v1540_v11 = vmul.f32 %v4530_v32, %v4602_v60  ;;  %v2013_v57 = vld [vmem:[#allocation7 + $0xd78] sm:$0xff]  ;;  %v2028_v60 = vld [vmem:[#allocation7 + $0xdf0] sm:$0xff] }
 0x1c8   :  { %3947 = vmatpush3.msra.mxu1 %v1947_v9  ;;  %3145 = vmatprep.mubr.f32.mxu1 %v1541_v0  ;;  %v1934_v6 = vld [vmem:[#allocation7 + $0xb00] sm:$0xff]  ;;  %v1997_v9 = vld [vmem:[#allocation7 + $0xcf8] sm:$0xff]  ;;  %v1571_v0 = vmul.f32 %v4540_v10, %v1102_v46 }
 0x1c9   :  { %3910 = vmatprep.subr.mxu0 %v1930_v12  ;;  %3948 = vmatprep.subr.mxu1 %v1962_v13  ;;  %v2029_v12 = vld [vmem:[#allocation7 + $0xdf8] sm:$0xff]  ;;  %v4613_v13 = vpop.f32.mrf.mxu0  ;;  %v2018_v46 = vld [vmem:[#allocation7 + $0xda0] sm:$0xff] }
 0x1ca   :  { %3911 = vmatpush3.msra.mxu0 %v1914_v14  ;;  %3949 = vmatpush3.msra.mxu1 %v1946_v15  ;;  %v1981_v14 = vld [vmem:[#allocation7 + $0xc78] sm:$0xff]  ;;  %v1573_v15 = vmul.f32 %v4540_v10, %v1179_v5 }
 0x1cb   :  { %3912 = vmatprep.subr.mxu0 %v1929_v16  ;;  %3950 = vmatprep.subr.mxu1 %v1961_v18  ;;  %v4616_v16 = vpop.f32.mrf.mxu1  ;;  %v1996_v18 = vld [vmem:[#allocation7 + $0xcf0] sm:$0xff]  ;;  %v1985_v5 = vld [vmem:[#allocation7 + $0xc98] sm:$0xff] }
 0x1cc   :  { %3913 = vmatpush3.msra.mxu0 %v1913_v19  ;;  %3951 = vmatpush3.msra.mxu1 %v1945_v21  ;;  %v1980_v19 = vld [vmem:[#allocation7 + $0xc70] sm:$0xff] }
 0x1cd   :  { %3914 = vmatprep.subr.mxu0 %v1928_v22  ;;  %3952 = vmatprep.subr.mxu1 %v1960_v63  ;;  %v2012_v21 = vld [vmem:[#allocation7 + $0xd70] sm:$0xff]  ;;  %v1570_v22 = vmul.f32 %v4540_v10, %v1100_v55  ;;  %v1250_v63 = vpop.f32.mrf.mxu0  ;;  %v2005_v55 = vld [vmem:[#allocation7 + $0xd38] sm:$0xff] }
 0x1ce   :  { %3915 = vmatpush3.msra.mxu0 %v1912_v24  ;;  %3953 = vmatpush3.msra.mxu1 %v1944_v3  ;;  %v1995_v24 = vld [vmem:[#allocation7 + $0xce8] sm:$0xff]  ;;  %v1572_v3 = vmul.f32 %v4540_v10, %v1177_v59  ;;  %v1972_v59 = vld [vmem:[#allocation7 + $0xc30] sm:$0xff] }
 0x1cf   :  { %3916 = vmatprep.subr.mxu0 %v1927_v25  ;;  %3954 = vmatprep.subr.mxu1 %v1959_v27  ;;  %v1327_v25 = vpop.f32.mrf.mxu1  ;;  %v2027_v27 = vld [vmem:[#allocation7 + $0xde8] sm:$0xff] }
 0x1d0   :  { %3917 = vmatpush3.msra.mxu0 %v1911_v17  ;;  %3955 = vmatpush3.msra.mxu1 %v1943_v28  ;;  %v1979_v17 = vld [vmem:[#allocation7 + $0xc68] sm:$0xff] }
 0x1d1   :  { %3918 = vmatprep.subr.mxu0 %v1926_v29  ;;  %3956 = vmatprep.subr.mxu1 %v1958_v30  ;;  %v2011_v28 = vld [vmem:[#allocation7 + $0xd68] sm:$0xff]  ;;  %v1543_v29 = vmul.f32 %v4530_v32, %v1250_v63  ;;  %v1994_v30 = vld [vmem:[#allocation7 + $0xce0] sm:$0xff] }
 0x1d2   :  { %3919 = vmatpush3.msra.mxu0 %v1910_v26  ;;  %3957 = vmatpush3.msra.mxu1 %v1942_v31  ;;  %v1545_v26 = vmul.f32 %v4530_v32, %v1327_v25  ;;  %v2026_v31 = vld [vmem:[#allocation7 + $0xde0] sm:$0xff] }
 0x1d3   :  { %3920 = vmatprep.subr.mxu0 %v1925_v33  ;;  %3958 = vmatprep.subr.mxu1 %v1957_v34  ;;  %v1978_v33 = vld [vmem:[#allocation7 + $0xc60] sm:$0xff] }
 0x1d4   :  { %3921 = vmatpush3.msra.mxu0 %v1909_v35  ;;  %3959 = vmatpush3.msra.mxu1 %v1941_v36  ;;  %v2010_v34 = vld [vmem:[#allocation7 + $0xd60] sm:$0xff]  ;;  %v1993_v35 = vld [vmem:[#allocation7 + $0xcd8] sm:$0xff] }
 0x1d5   :  { %3922 = vmatprep.subr.mxu0 %v1924_v7  ;;  %3960 = vmatprep.subr.mxu1 %v1956_v38  ;;  %v2025_v36 = vld [vmem:[#allocation7 + $0xdd8] sm:$0xff] }
 0x1d6   :  { %3923 = vmatpush3.msra.mxu0 %v1908_v39  ;;  %3961 = vmatpush3.msra.mxu1 %v1940_v20  ;;  %v1977_v7 = vld [vmem:[#allocation7 + $0xc58] sm:$0xff]  ;;  %v1992_v39 = vld [vmem:[#allocation7 + $0xcd0] sm:$0xff] }
 0x1d7   :  { %3924 = vmatprep.subr.mxu0 %v1923_v41  ;;  %3962 = vmatprep.subr.mxu1 %v1955_v23  ;;  %v2009_v38 = vld [vmem:[#allocation7 + $0xd58] sm:$0xff]  ;;  %v2024_v20 = vld [vmem:[#allocation7 + $0xdd0] sm:$0xff] }
 0x1d8   :  { %3925 = vmatpush3.msra.mxu0 %v1907_v42  ;;  %3963 = vmatpush3.msra.mxu1 %v1939_v43  ;;  %v1976_v41 = vld [vmem:[#allocation7 + $0xc50] sm:$0xff]  ;;  %v1991_v42 = vld [vmem:[#allocation7 + $0xcc8] sm:$0xff] }
 0x1d9   :  { %3926 = vmatprep.subr.mxu0 %v1922_v44  ;;  %3964 = vmatprep.subr.mxu1 %v1954_v45  ;;  %v2008_v23 = vld [vmem:[#allocation7 + $0xd50] sm:$0xff]  ;;  %v2023_v43 = vld [vmem:[#allocation7 + $0xdc8] sm:$0xff] }
 0x1da   :  { %3927 = vmatpush3.msra.mxu0 %v1906_v47  ;;  %3965 = vmatpush3.msra.mxu1 %v1938_v48  ;;  %v1975_v44 = vld [vmem:[#allocation7 + $0xc48] sm:$0xff]  ;;  %v1990_v47 = vld [vmem:[#allocation7 + $0xcc0] sm:$0xff] }
 0x1db   :  { %3928 = vmatprep.subr.mxu0 %v1921_v50  ;;  %3966 = vmatprep.subr.mxu1 %v1953_v51  ;;  %v2007_v45 = vld [vmem:[#allocation7 + $0xd48] sm:$0xff]  ;;  %v2022_v48 = vld [vmem:[#allocation7 + $0xdc0] sm:$0xff] }
 0x1dc   :  { %3929 = vmatpush3.msra.mxu0 %v1905_v52  ;;  %3967 = vmatpush3.msra.mxu1 %v1937_v53  ;;  %v1974_v50 = vld [vmem:[#allocation7 + $0xc40] sm:$0xff]  ;;  %v1989_v52 = vld [vmem:[#allocation7 + $0xcb8] sm:$0xff] }
 0x1dd   :  { %3930 = vmatprep.subr.mxu0 %v1920_v54  ;;  %3968 = vmatprep.subr.mxu1 %v1952_v56  ;;  %v2006_v51 = vld [vmem:[#allocation7 + $0xd40] sm:$0xff]  ;;  %v2021_v53 = vld [vmem:[#allocation7 + $0xdb8] sm:$0xff]  ;;  %v1988_v56 = vld [vmem:[#allocation7 + $0xcb0] sm:$0xff] }
 0x1de   :  { %3931 = vmatpush3.msra.mxu0 %v1904_v58  ;;  %3969 = vmatpush3.msra.mxu1 %v1936_v37  ;;  %v1973_v54 = vld [vmem:[#allocation7 + $0xc38] sm:$0xff]  ;;  %v2020_v58 = vld [vmem:[#allocation7 + $0xdb0] sm:$0xff] }
 0x1df   :  { %3932 = vmatprep.subr.mxu0 %v1919_v61  ;;  %3970 = vmatprep.subr.mxu1 %v1951_v40  ;;  %v2004_v37 = vld [vmem:[#allocation7 + $0xd30] sm:$0xff]  ;;  %v1987_v61 = vld [vmem:[#allocation7 + $0xca8] sm:$0xff] }
 0x1e0   :  { %3933 = vmatpush3.msra.mxu0 %v1903_v62  ;;  %3971 = vmatpush3.msra.mxu1 %v1935_v1  ;;  %v2019_v40 = vld [vmem:[#allocation7 + $0xda8] sm:$0xff] }
 0x1e1   :  { %3934 = vmatprep.subr.mxu0 %v1918_v2  ;;  %3972 = vmatprep.subr.mxu1 %v1950_v4  ;;  %v1971_v62 = vld [vmem:[#allocation7 + $0xc28] sm:$0xff]  ;;  %v1986_v2 = vld [vmem:[#allocation7 + $0xca0] sm:$0xff] }
 0x1e2   :  { %3935 = vmatpush3.msra.mxu0 %v1902_v49  ;;  %3973 = vmatpush3.msra.mxu1 %v1934_v6  ;;  %v2003_v1 = vld [vmem:[#allocation7 + $0xd28] sm:$0xff]  ;;  %v1970_v4 = vld [vmem:[#allocation7 + $0xc20] sm:$0xff]  ;;  %v2017_v6 = vld [vmem:[#allocation7 + $0xd98] sm:$0xff] }
 0x1e3   :  { %3071 = vmatmul.mubr.f32.vlgmr.msra.gmra.mxu0 %v1538_v8  ;;  %3146 = vmatmul.mubr.f32.vlgmr.msra.gmra.mxu1 %v1540_v11  ;;  %v2002_v49 = vld [vmem:[#allocation7 + $0xd20] sm:$0xff]  ;;  %v1969_v8 = vld [vmem:[#allocation7 + $0xc18] sm:$0xff]  ;;  %v1984_v11 = vld [vmem:[#allocation7 + $0xc90] sm:$0xff] }
 0x1e4   :  { %3980 = vmatprep.subr.mxu0 %v1997_v9  ;;  %4018 = vmatprep.subr.mxu1 %v2029_v12  ;;  %v2001_v9 = vld [vmem:[#allocation7 + $0xd18] sm:$0xff]  ;;  %v1254_v12 = vpop.f32.mrf.mxu0 }
 0x1e5   :  { %3075 = vmatprep.mubr.f32.mxu0 %v1571_v0  ;;  %3150 = vmatprep.mubr.f32.mxu1 %v1573_v15  ;;  %v2016_v0 = vld [vmem:[#allocation7 + $0xd90] sm:$0xff]  ;;  %v1331_v15 = vpop.f32.mrf.mxu1 }
 0x1e6   :  { %3981 = vmatpush3.msra.mxu0 %v1981_v14  ;;  %4019 = vmatpush3.msra.mxu1 %v2013_v57  ;;  %v1968_v14 = vld [vmem:[#allocation7 + $0xc10] sm:$0xff]  ;;  %v1256_v63 = vpop.f32.mrf.mxu0 }
 0x1e7   :  { %3982 = vmatprep.subr.mxu0 %v1996_v18  ;;  %4020 = vmatprep.subr.mxu1 %v2028_v60  ;;  %v2000_v57 = vld [vmem:[#allocation7 + $0xd10] sm:$0xff]  ;;  %v1983_v18 = vld [vmem:[#allocation7 + $0xc88] sm:$0xff]  ;;  %v1333_v25 = vpop.f32.mrf.mxu1 }
 0x1e8   :  { %3983 = vmatpush3.msra.mxu0 %v1980_v19  ;;  %4021 = vmatpush3.msra.mxu1 %v2012_v21  ;;  %v2015_v60 = vld [vmem:[#allocation7 + $0xd88] sm:$0xff] }
 0x1e9   :  { %3076 = vmatmul.mubr.f32.gmra.mxu0 %v1570_v22  ;;  %3151 = vmatmul.mubr.f32.gmra.mxu1 %v1572_v3  ;;  %v1967_v19 = vld [vmem:[#allocation7 + $0xc08] sm:$0xff]  ;;  %v1982_v22 = vld [vmem:[#allocation7 + $0xc80] sm:$0xff] }
 0x1ea   :  { %3984 = vmatprep.subr.mxu0 %v1995_v24  ;;  %4022 = vmatprep.subr.mxu1 %v2027_v27  ;;  %v1999_v21 = vld [vmem:[#allocation7 + $0xd08] sm:$0xff]  ;;  %v2014_v24 = vld [vmem:[#allocation7 + $0xd80] sm:$0xff] }
 0x1eb   :  { %3985 = vmatpush3.msra.mxu0 %v1979_v17  ;;  %3220 = vmatprep.mubr.f32.mxu0 %v1543_v29  ;;  %v1966_v3 = vld [vmem:[#allocation7 + $0xc00] sm:$0xff]  ;;  %v1542_v17 = vmul.f32 %v4530_v32, %v4613_v13  ;;  %v1544_v29 = vmul.f32 %v4530_v32, %v4616_v16  ;;  %v2077_v13 = vld [vmem:[#allocation7 + $0xf78] sm:$0xff]  ;;  %v2092_v16 = vld [vmem:[#allocation7 + $0xff0] sm:$0xff] }
 0x1ec   :  { %4023 = vmatpush3.msra.mxu1 %v2011_v28  ;;  %3295 = vmatprep.mubr.f32.mxu1 %v1545_v26  ;;  %v1998_v27 = vld [vmem:[#allocation7 + $0xd00] sm:$0xff]  ;;  %v2061_v28 = vld [vmem:[#allocation7 + $0xef8] sm:$0xff]  ;;  %v1575_v26 = vmul.f32 %v4540_v10, %v1256_v63 }
 0x1ed   :  { %3986 = vmatprep.subr.mxu0 %v1994_v30  ;;  %4024 = vmatprep.subr.mxu1 %v2026_v31  ;;  %v2093_v30 = vld [vmem:[#allocation7 + $0xff8] sm:$0xff]  ;;  %v4627_v31 = vpop.f32.mrf.mxu0  ;;  %v2082_v63 = vld [vmem:[#allocation7 + $0xfa0] sm:$0xff] }
 0x1ee   :  { %3987 = vmatpush3.msra.mxu0 %v1978_v33  ;;  %4025 = vmatpush3.msra.mxu1 %v2010_v34  ;;  %v2045_v33 = vld [vmem:[#allocation7 + $0xe78] sm:$0xff]  ;;  %v1577_v34 = vmul.f32 %v4540_v10, %v1333_v25 }
 0x1ef   :  { %3988 = vmatprep.subr.mxu0 %v1993_v35  ;;  %4026 = vmatprep.subr.mxu1 %v2025_v36  ;;  %v4630_v35 = vpop.f32.mrf.mxu1  ;;  %v2060_v36 = vld [vmem:[#allocation7 + $0xef0] sm:$0xff]  ;;  %v2049_v25 = vld [vmem:[#allocation7 + $0xe98] sm:$0xff] }
 0x1f0   :  { %3989 = vmatpush3.msra.mxu0 %v1977_v7  ;;  %4027 = vmatpush3.msra.mxu1 %v2009_v38  ;;  %v2044_v7 = vld [vmem:[#allocation7 + $0xe70] sm:$0xff] }
 0x1f1   :  { %3990 = vmatprep.subr.mxu0 %v1992_v39  ;;  %4028 = vmatprep.subr.mxu1 %v2024_v20  ;;  %v2076_v38 = vld [vmem:[#allocation7 + $0xf70] sm:$0xff]  ;;  %v1574_v39 = vmul.f32 %v4540_v10, %v1254_v12  ;;  %v1404_v20 = vpop.f32.mrf.mxu0  ;;  %v2069_v12 = vld [vmem:[#allocation7 + $0xf38] sm:$0xff] }
 0x1f2   :  { %3991 = vmatpush3.msra.mxu0 %v1976_v41  ;;  %4029 = vmatpush3.msra.mxu1 %v2008_v23  ;;  %v2059_v41 = vld [vmem:[#allocation7 + $0xee8] sm:$0xff]  ;;  %v1576_v23 = vmul.f32 %v4540_v10, %v1331_v15  ;;  %v2036_v15 = vld [vmem:[#allocation7 + $0xe30] sm:$0xff] }
 0x1f3   :  { %3992 = vmatprep.subr.mxu0 %v1991_v42  ;;  %4030 = vmatprep.subr.mxu1 %v2023_v43  ;;  %v1481_v42 = vpop.f32.mrf.mxu1  ;;  %v2091_v43 = vld [vmem:[#allocation7 + $0xfe8] sm:$0xff] }
 0x1f4   :  { %3993 = vmatpush3.msra.mxu0 %v1975_v44  ;;  %4031 = vmatpush3.msra.mxu1 %v2007_v45  ;;  %v2043_v44 = vld [vmem:[#allocation7 + $0xe68] sm:$0xff] }
 0x1f5   :  { %3994 = vmatprep.subr.mxu0 %v1990_v47  ;;  %4032 = vmatprep.subr.mxu1 %v2022_v48  ;;  %v2075_v45 = vld [vmem:[#allocation7 + $0xf68] sm:$0xff]  ;;  %v1547_v47 = vmul.f32 %v4530_v32, %v1404_v20  ;;  %v2058_v48 = vld [vmem:[#allocation7 + $0xee0] sm:$0xff] }
 0x1f6   :  { %3995 = vmatpush3.msra.mxu0 %v1974_v50  ;;  %4033 = vmatpush3.msra.mxu1 %v2006_v51  ;;  %v1549_v50 = vmul.f32 %v4530_v32, %v1481_v42  ;;  %v2090_v51 = vld [vmem:[#allocation7 + $0xfe0] sm:$0xff] }
 0x1f7   :  { %3996 = vmatprep.subr.mxu0 %v1989_v52  ;;  %4034 = vmatprep.subr.mxu1 %v2021_v53  ;;  %v2042_v52 = vld [vmem:[#allocation7 + $0xe60] sm:$0xff] }
 0x1f8   :  { %3997 = vmatpush3.msra.mxu0 %v1973_v54  ;;  %4035 = vmatpush3.msra.mxu1 %v2005_v55  ;;  %v2074_v53 = vld [vmem:[#allocation7 + $0xf60] sm:$0xff]  ;;  %v2057_v54 = vld [vmem:[#allocation7 + $0xed8] sm:$0xff] }
 0x1f9   :  { %3998 = vmatprep.subr.mxu0 %v1988_v56  ;;  %4036 = vmatprep.subr.mxu1 %v2020_v58  ;;  %v2089_v55 = vld [vmem:[#allocation7 + $0xfd8] sm:$0xff] }
 0x1fa   :  { %3999 = vmatpush3.msra.mxu0 %v1972_v59  ;;  %4037 = vmatpush3.msra.mxu1 %v2004_v37  ;;  %v2041_v56 = vld [vmem:[#allocation7 + $0xe58] sm:$0xff]  ;;  %v2056_v59 = vld [vmem:[#allocation7 + $0xed0] sm:$0xff] }
 0x1fb   :  { %4000 = vmatprep.subr.mxu0 %v1987_v61  ;;  %4038 = vmatprep.subr.mxu1 %v2019_v40  ;;  %v2073_v58 = vld [vmem:[#allocation7 + $0xf58] sm:$0xff]  ;;  %v2088_v37 = vld [vmem:[#allocation7 + $0xfd0] sm:$0xff] }
 0x1fc   :  { %4001 = vmatpush3.msra.mxu0 %v1971_v62  ;;  %4039 = vmatpush3.msra.mxu1 %v2003_v1  ;;  %v2040_v61 = vld [vmem:[#allocation7 + $0xe50] sm:$0xff]  ;;  %v2055_v62 = vld [vmem:[#allocation7 + $0xec8] sm:$0xff] }
 0x1fd   :  { %4002 = vmatprep.subr.mxu0 %v1986_v2  ;;  %4040 = vmatprep.subr.mxu1 %v2018_v46  ;;  %v2072_v40 = vld [vmem:[#allocation7 + $0xf50] sm:$0xff]  ;;  %v2087_v1 = vld [vmem:[#allocation7 + $0xfc8] sm:$0xff] }
 0x1fe   :  { %4003 = vmatpush3.msra.mxu0 %v1970_v4  ;;  %4041 = vmatpush3.msra.mxu1 %v2002_v49  ;;  %v2039_v2 = vld [vmem:[#allocation7 + $0xe48] sm:$0xff]  ;;  %v2054_v4 = vld [vmem:[#allocation7 + $0xec0] sm:$0xff] }
 0x1ff   :  { %4004 = vmatprep.subr.mxu0 %v1985_v5  ;;  %4042 = vmatprep.subr.mxu1 %v2017_v6  ;;  %v2071_v46 = vld [vmem:[#allocation7 + $0xf48] sm:$0xff]  ;;  %v2086_v49 = vld [vmem:[#allocation7 + $0xfc0] sm:$0xff] }
 0x200   :  { %4005 = vmatpush3.msra.mxu0 %v1969_v8  ;;  %4043 = vmatpush3.msra.mxu1 %v2001_v9  ;;  %v2038_v5 = vld [vmem:[#allocation7 + $0xe40] sm:$0xff]  ;;  %v2053_v8 = vld [vmem:[#allocation7 + $0xeb8] sm:$0xff] }
 0x201   :  { %4006 = vmatprep.subr.mxu0 %v1984_v11  ;;  %4044 = vmatprep.subr.mxu1 %v2016_v0  ;;  %v2070_v6 = vld [vmem:[#allocation7 + $0xf40] sm:$0xff]  ;;  %v2085_v9 = vld [vmem:[#allocation7 + $0xfb8] sm:$0xff]  ;;  %v2052_v0 = vld [vmem:[#allocation7 + $0xeb0] sm:$0xff] }
 0x202   :  { %4007 = vmatpush3.msra.mxu0 %v1968_v14  ;;  %4045 = vmatpush3.msra.mxu1 %v2000_v57  ;;  %v2037_v11 = vld [vmem:[#allocation7 + $0xe38] sm:$0xff]  ;;  %v2084_v14 = vld [vmem:[#allocation7 + $0xfb0] sm:$0xff] }
 0x203   :  { %4008 = vmatprep.subr.mxu0 %v1983_v18  ;;  %4046 = vmatprep.subr.mxu1 %v2015_v60  ;;  %v2068_v57 = vld [vmem:[#allocation7 + $0xf30] sm:$0xff]  ;;  %v2051_v18 = vld [vmem:[#allocation7 + $0xea8] sm:$0xff] }
 0x204   :  { %4009 = vmatpush3.msra.mxu0 %v1967_v19  ;;  %4047 = vmatpush3.msra.mxu1 %v1999_v21  ;;  %v2083_v60 = vld [vmem:[#allocation7 + $0xfa8] sm:$0xff] }
 0x205   :  { %4010 = vmatprep.subr.mxu0 %v1982_v22  ;;  %4048 = vmatprep.subr.mxu1 %v2014_v24  ;;  %v2035_v19 = vld [vmem:[#allocation7 + $0xe28] sm:$0xff]  ;;  %v2050_v22 = vld [vmem:[#allocation7 + $0xea0] sm:$0xff] }
 0x206   :  { %4011 = vmatpush3.msra.mxu0 %v1966_v3  ;;  %4049 = vmatpush3.msra.mxu1 %v1998_v27  ;;  %v2067_v21 = vld [vmem:[#allocation7 + $0xf28] sm:$0xff]  ;;  %v2034_v24 = vld [vmem:[#allocation7 + $0xe20] sm:$0xff]  ;;  %v2081_v27 = vld [vmem:[#allocation7 + $0xf98] sm:$0xff] }
 0x207   :  { %3221 = vmatmul.mubr.f32.vlgmr.msra.gmra.mxu0 %v1542_v17  ;;  %3296 = vmatmul.mubr.f32.vlgmr.msra.gmra.mxu1 %v1544_v29  ;;  %v2066_v3 = vld [vmem:[#allocation7 + $0xf20] sm:$0xff]  ;;  %v2033_v17 = vld [vmem:[#allocation7 + $0xe18] sm:$0xff]  ;;  %v2048_v29 = vld [vmem:[#allocation7 + $0xe90] sm:$0xff] }
 0x208   :  { %4056 = vmatprep.subr.mxu0 %v2061_v28  ;;  %4094 = vmatprep.subr.mxu1 %v2093_v30  ;;  %v2065_v28 = vld [vmem:[#allocation7 + $0xf18] sm:$0xff]  ;;  %v1408_v30 = vpop.f32.mrf.mxu0 }
 0x209   :  { %3225 = vmatprep.mubr.f32.mxu0 %v1575_v26  ;;  %3300 = vmatprep.mubr.f32.mxu1 %v1577_v34  ;;  %v2080_v26 = vld [vmem:[#allocation7 + $0xf90] sm:$0xff]  ;;  %v1485_v34 = vpop.f32.mrf.mxu1 }
 0x20a   :  { %4057 = vmatpush3.msra.mxu0 %v2045_v33  ;;  %4095 = vmatpush3.msra.mxu1 %v2077_v13  ;;  %v2032_v33 = vld [vmem:[#allocation7 + $0xe10] sm:$0xff]  ;;  %v1410_v20 = vpop.f32.mrf.mxu0 }
 0x20b   :  { %4058 = vmatprep.subr.mxu0 %v2060_v36  ;;  %4096 = vmatprep.subr.mxu1 %v2092_v16  ;;  %v2064_v13 = vld [vmem:[#allocation7 + $0xf10] sm:$0xff]  ;;  %v2047_v36 = vld [vmem:[#allocation7 + $0xe88] sm:$0xff]  ;;  %v1487_v42 = vpop.f32.mrf.mxu1 }
 0x20c   :  { %4059 = vmatpush3.msra.mxu0 %v2044_v7  ;;  %4097 = vmatpush3.msra.mxu1 %v2076_v38  ;;  %v2079_v16 = vld [vmem:[#allocation7 + $0xf88] sm:$0xff] }
 0x20d   :  { %3226 = vmatmul.mubr.f32.gmra.mxu0 %v1574_v39  ;;  %3301 = vmatmul.mubr.f32.gmra.mxu1 %v1576_v23  ;;  %v2031_v7 = vld [vmem:[#allocation7 + $0xe08] sm:$0xff]  ;;  %v2046_v39 = vld [vmem:[#allocation7 + $0xe80] sm:$0xff] }
 0x20e   :  { %4060 = vmatprep.subr.mxu0 %v2059_v41  ;;  %4098 = vmatprep.subr.mxu1 %v2091_v43  ;;  %v2063_v38 = vld [vmem:[#allocation7 + $0xf08] sm:$0xff]  ;;  %v2078_v41 = vld [vmem:[#allocation7 + $0xf80] sm:$0xff] }
 0x20f   :  { %4061 = vmatpush3.msra.mxu0 %v2043_v44  ;;  %3370 = vmatprep.mubr.f32.mxu0 %v1547_v47  ;;  %v2030_v23 = vld [vmem:[#allocation7 + $0xe00] sm:$0xff]  ;;  %v1546_v44 = vmul.f32 %v4530_v32, %v4627_v31  ;;  %v1579_v47 = vmul.f32 %v4540_v10, %v1410_v20  ;;  %v1580_v31 = vmul.f32 %v4540_v10, %v1485_v34 }
 0x210   :  { %4099 = vmatpush3.msra.mxu1 %v2075_v45  ;;  %3445 = vmatprep.mubr.f32.mxu1 %v1549_v50  ;;  %v2062_v43 = vld [vmem:[#allocation7 + $0xf00] sm:$0xff]  ;;  %v1548_v45 = vmul.f32 %v4530_v32, %v4630_v35  ;;  %v1578_v50 = vmul.f32 %v4540_v10, %v1408_v30  ;;  %v4153_v32 = vpop.f32.mrf.mxu1 }
 0x211   :  { %4062 = vmatprep.subr.mxu0 %v2058_v48  ;;  %4100 = vmatprep.subr.mxu1 %v2090_v51  ;;  %v1581_v48 = vmul.f32 %v4540_v10, %v1487_v42  ;;  %v4142_v51 = vpop.f32.mrf.mxu0 }
 0x212   :  { %4063 = vmatpush3.msra.mxu0 %v2042_v52  ;;  %4101 = vmatpush3.msra.mxu1 %v2074_v53  ;;  %v2247_v53 = vpop.f32.mrf.mxu1 }
 0x213   :  { %4064 = vmatprep.subr.mxu0 %v2057_v54  ;;  %4102 = vmatprep.subr.mxu1 %v2089_v55  ;;  %v2172_v52 = vpop.f32.mrf.mxu0 }
 0x214   :  { %4065 = vmatpush3.msra.mxu0 %v2041_v56  ;;  %4103 = vmatpush3.msra.mxu1 %v2073_v58  ;;  %v3594_v55 = vpop.f32.mrf.mxu1 }
 0x215   :  { %4066 = vmatprep.subr.mxu0 %v2056_v59  ;;  %4104 = vmatprep.subr.mxu1 %v2088_v37  ;;  %v3556_v35 = vpop.f32.mrf.mxu0 }
 0x216   :  { %4067 = vmatpush3.msra.mxu0 %v2040_v61  ;;  %4105 = vmatpush3.msra.mxu1 %v2072_v40  ;;  %v3595_v58 = vpop.f32.mrf.mxu1 }
 0x217   :  { %4068 = vmatprep.subr.mxu0 %v2055_v62  ;;  %4106 = vmatprep.subr.mxu1 %v2087_v1  ;;  %v3557_v54 = vpop.f32.mrf.mxu0  ;;  %v3596_v34 = vadd.f32 %v3595_v58, %v3594_v55 }
 0x218   :  { %4069 = vmatpush3.msra.mxu0 %v2039_v2  ;;  %4107 = vmatpush3.msra.mxu1 %v2071_v46  ;;  %v3597_v59 = vpop.f32.mrf.mxu1 }
 0x219   :  { %4070 = vmatprep.subr.mxu0 %v2054_v4  ;;  %4108 = vmatprep.subr.mxu1 %v2086_v49  ;;  %v3559_v56 = vpop.f32.mrf.mxu0 }
 0x21a   :  { %4071 = vmatpush3.msra.mxu0 %v2038_v5  ;;  %4109 = vmatpush3.msra.mxu1 %v2070_v6  ;;  %v3598_v40 = vpop.f32.mrf.mxu1 }
 0x21b   :  { %4072 = vmatprep.subr.mxu0 %v2053_v8  ;;  %4110 = vmatprep.subr.mxu1 %v2085_v9  ;;  %v3560_v37 = vpop.f32.mrf.mxu0 }
 0x21c   :  { %4073 = vmatpush3.msra.mxu0 %v2037_v11  ;;  %4111 = vmatpush3.msra.mxu1 %v2069_v12  ;;  %v3670_v62 = vpop.f32.mrf.mxu1 }
 0x21d   :  { %4074 = vmatprep.subr.mxu0 %v2052_v0  ;;  %4112 = vmatprep.subr.mxu1 %v2084_v14  ;;  %v3632_v61 = vpop.f32.mrf.mxu0 }
 0x21e   :  { %4075 = vmatpush3.msra.mxu0 %v2036_v15  ;;  %4113 = vmatpush3.msra.mxu1 %v2068_v57  ;;  %v3671_v2 = vpop.f32.mrf.mxu1 }
 0x21f   :  { %4076 = vmatprep.subr.mxu0 %v2051_v18  ;;  %4114 = vmatprep.subr.mxu1 %v2083_v60  ;;  %v3633_v1 = vpop.f32.mrf.mxu0 }
 0x220   :  { %4077 = vmatpush3.msra.mxu0 %v2035_v19  ;;  %4115 = vmatpush3.msra.mxu1 %v2067_v21  ;;  %v3673_v10 = vpop.f32.mrf.mxu1 }
 0x221   :  { %4078 = vmatprep.subr.mxu0 %v2050_v22  ;;  %4116 = vmatprep.subr.mxu1 %v2082_v63  ;;  %v3635_v46 = vpop.f32.mrf.mxu0 }
 0x222   :  { %4079 = vmatpush3.msra.mxu0 %v2034_v24  ;;  %4117 = vmatpush3.msra.mxu1 %v2066_v3  ;;  %v3674_v5 = vpop.f32.mrf.mxu1  ;;  %v3558_v3 = vadd.f32 %v3557_v54, %v3556_v35 }
 0x223   :  { %4080 = vmatprep.subr.mxu0 %v2049_v25  ;;  %4118 = vmatprep.subr.mxu1 %v2081_v27  ;;  %v3636_v4 = vpop.f32.mrf.mxu0 }
 0x224   :  { %4081 = vmatpush3.msra.mxu0 %v2033_v17  ;;  %4119 = vmatpush3.msra.mxu1 %v2065_v28  ;;  %v2248_v17 = vadd.f32 %v2247_v53, %v2172_v52  ;;  %v3675_v52 = vadd.f32 %v3674_v5, %v3673_v10 }
 0x225   :  { %4082 = vmatprep.subr.mxu0 %v2048_v29  ;;  %4120 = vmatprep.subr.mxu1 %v2080_v26  ;;  %v3561_v29 = vadd.f32 %v3560_v37, %v3559_v56 }
 0x226   :  { %4083 = vmatpush3.msra.mxu0 %v2032_v33  ;;  %4121 = vmatpush3.msra.mxu1 %v2064_v13  ;;  %v2323_v28 = vadd.f32 %v3558_v3, %v2248_v17  ;;  %v2253_v33 = vadd.f32 %v4153_v32, %v4142_v51  ;;  %v3634_v13 = vadd.f32 %v3633_v1, %v3632_v61 }
 0x227   :  { %4084 = vmatprep.subr.mxu0 %v2047_v36  ;;  %4122 = vmatprep.subr.mxu1 %v2079_v16 }
 0x228   :  { %4085 = vmatpush3.msra.mxu0 %v2031_v7  ;;  %4123 = vmatpush3.msra.mxu1 %v2063_v38  ;;  %v2398_v36 = vadd.f32 %v3596_v34, %v2323_v28  ;;  %v2328_v16 = vadd.f32 %v3561_v29, %v2253_v33  ;;  %v3599_v7 = vadd.f32 %v3598_v40, %v3597_v59 }
 0x229   :  { %4086 = vmatprep.subr.mxu0 %v2046_v39  ;;  %4124 = vmatprep.subr.mxu1 %v2078_v41  ;;  %v3637_v41 = vadd.f32 %v3636_v4, %v3635_v46 }
 0x22a   :  { %4087 = vmatpush3.msra.mxu0 %v2030_v23  ;;  %4125 = vmatpush3.msra.mxu1 %v2062_v43  ;;  %v2473_v20 = vadd.f32 %v3634_v13, %v2398_v36  ;;  %v2403_v42 = vadd.f32 %v3599_v7, %v2328_v16  ;;  %v3672_v43 = vadd.f32 %v3671_v2, %v3670_v62 }
 0x22b   :  { %3371 = vmatmul.mubr.f32.vlgmr.msra.gmra.mxu0 %v1546_v44  ;;  %3446 = vmatmul.mubr.f32.vlgmr.msra.gmra.mxu1 %v1548_v45 }
 0x22c   :  { %3375 = vmatprep.mubr.f32.mxu0 %v1579_v47  ;;  %3450 = vmatprep.mubr.f32.mxu1 %v1581_v48  ;;  %v2548_v47 = vadd.f32 %v3672_v43, %v2473_v20  ;;  %v2478_v48 = vadd.f32 %v3637_v41, %v2403_v42 }
 0x22e   :  { %v2553_v35 = vadd.f32 %v3675_v52, %v2478_v48 }
 0x22f   :  { %3376 = vmatmul.mubr.f32.gmra.mxu0 %v1578_v50  ;;  %3451 = vmatmul.mubr.f32.gmra.mxu1 %v1580_v31 }
 0x237   :  { %v3708_v49 = vpop.f32.mrf.mxu0  ;;  %v3746_v6 = vpop.f32.mrf.mxu1 }
 0x239   :  { %v3709_v8 = vpop.f32.mrf.mxu0  ;;  %v3747_v9 = vpop.f32.mrf.mxu1 }
 0x23a   :  { %v3710_v44 = vadd.f32 %v3709_v8, %v3708_v49  ;;  %v3748_v53 = vadd.f32 %v3747_v9, %v3746_v6 }
 0x23c   :  { %v2623_v51 = vadd.f32 %v3710_v44, %v2548_v47 }
 0x23d   :  { %v3711_v11 = vpop.f32.mrf.mxu0  ;;  %v3749_v12 = vpop.f32.mrf.mxu1 }
 0x23e   :  { %v2698_v58 = vadd.f32 %v3748_v53, %v2623_v51 }
 0x23f   :  { %v3712_v0 = vpop.f32.mrf.mxu0  ;;  %v3750_v15 = vpop.f32.mrf.mxu1 }
 0x240   :  { %v3713_v32 = vadd.f32 %v3712_v0, %v3711_v11  ;;  %v3751_v37 = vadd.f32 %v3750_v15, %v3749_v12 }
 0x242   :  { %v2628_v59 = vadd.f32 %v3713_v32, %v2553_v35 }
 0x244   :  { %v2703_v2 = vadd.f32 %v3751_v37, %v2628_v59 }
 0x25b   :  { %v3784_v14 = vpop.f32.mrf.mxu0  ;;  %v3822_v57 = vpop.f32.mrf.mxu1 }
 0x25d   :  { %v3785_v18 = vpop.f32.mrf.mxu0  ;;  %v3823_v60 = vpop.f32.mrf.mxu1 }
 0x25e   :  { %v3786_v54 = vadd.f32 %v3785_v18, %v3784_v14  ;;  %v3824_v46 = vadd.f32 %v3823_v60, %v3822_v57 }
 0x260   :  { %v2773_v61 = vadd.f32 %v3786_v54, %v2698_v58 }
 0x261   :  { %v3787_v19 = vpop.f32.mrf.mxu0  ;;  %v3825_v21 = vpop.f32.mrf.mxu1 }
 0x262   :  { %v2848_v8 = vadd.f32 %v3824_v46, %v2773_v61 }
 0x263   :  { %v3788_v22 = vpop.f32.mrf.mxu0  ;;  %v3826_v24 = vpop.f32.mrf.mxu1 }
 0x264   :  { %v3789_v40 = vadd.f32 %v3788_v22, %v3787_v19  ;;  %v3827_v11 = vadd.f32 %v3826_v24, %v3825_v21 }
 0x266   :  { %v2778_v10 = vadd.f32 %v3789_v40, %v2703_v2 }
 0x268   :  { %v2853_v18 = vadd.f32 %v3827_v11, %v2778_v10 }
 0x27f   :  { %v3860_v63 = vpop.f32.mrf.mxu0  ;;  %v3898_v25 = vpop.f32.mrf.mxu1 }
 0x281   :  { %v3861_v27 = vpop.f32.mrf.mxu0  ;;  %v3899_v30 = vpop.f32.mrf.mxu1 }
 0x282   :  { %v3862_v4 = vadd.f32 %v3861_v27, %v3860_v63  ;;  %v3900_v3 = vadd.f32 %v3899_v30, %v3898_v25 }
 0x284   :  { %v2923_v0 = vadd.f32 %v3862_v4, %v2848_v8 }
 0x285   :  { %v3863_v26 = vpop.f32.mrf.mxu0  ;;  %v3901_v38 = vpop.f32.mrf.mxu1 }
 0x286   :  { %v2998_v12 = vadd.f32 %v3900_v3, %v2923_v0 }
 0x287   :  { %v3864_v39 = vpop.f32.mrf.mxu0  ;;  %v3902_v45 = vpop.f32.mrf.mxu1 }
 0x288   :  { %v3865_v6 = vadd.f32 %v3864_v39, %v3863_v26  ;;  %v3903_v28 = vadd.f32 %v3902_v45, %v3901_v38 }
 0x28a   :  { %v2928_v15 = vadd.f32 %v3865_v6, %v2853_v18 }
 0x28c   :  { %v3003_v60 = vadd.f32 %v3903_v28, %v2928_v15 }
 0x2a3   :  { %v3936_v23 = vpop.f32.mrf.mxu0  ;;  %v3974_v50 = vpop.f32.mrf.mxu1 }
 0x2a5   :  { %v3937_v31 = vpop.f32.mrf.mxu0  ;;  %v3975_v55 = vpop.f32.mrf.mxu1 }
 0x2a6   :  { %v3938_v17 = vadd.f32 %v3937_v31, %v3936_v23  ;;  %v3976_v63 = vadd.f32 %v3975_v55, %v3974_v50  ;;  %v3511_v50 = vld [vmem:[#allocation12] ss:$0 sm:$0xff] }
 0x2a8   :  { %v3073_v29 = vadd.f32 %v3938_v17, %v2998_v12 }
 0x2a9   :  { %v3939_v56 = vpop.f32.mrf.mxu0  ;;  %v3977_v62 = vpop.f32.mrf.mxu1 }
 0x2aa   :  { %v3148_v21 = vadd.f32 %v3976_v63, %v3073_v29 }
 0x2ab   :  { %v3940_v1 = vpop.f32.mrf.mxu0  ;;  %v3978_v5 = vpop.f32.mrf.mxu1 }
 0x2ac   :  { %v3941_v57 = vadd.f32 %v3940_v1, %v3939_v56  ;;  %v3979_v26 = vadd.f32 %v3978_v5, %v3977_v62 }
 0x2ae   :  { %v3078_v24 = vadd.f32 %v3941_v57, %v3003_v60 }
 0x2b0   :  { %v3153_v30 = vadd.f32 %v3979_v26, %v3078_v24 }
 0x2c7   :  { %v4012_v49 = vpop.f32.mrf.mxu0  ;;  %v4050_v9 = vpop.f32.mrf.mxu1 }
 0x2c9   :  { %v4013_v14 = vpop.f32.mrf.mxu0  ;;  %v4051_v19 = vpop.f32.mrf.mxu1 }
 0x2ca   :  { %v4014_v27 = vadd.f32 %v4013_v14, %v4012_v49  ;;  %v4052_v7 = vadd.f32 %v4051_v19, %v4050_v9 }
 0x2cc   :  { %v3223_v13 = vadd.f32 %v4014_v27, %v3148_v21 }
 0x2cd   :  { %v4015_v22 = vpop.f32.mrf.mxu0  ;;  %v4053_v33 = vpop.f32.mrf.mxu1 }
 0x2ce   :  { %v3298_v41 = vadd.f32 %v4052_v7, %v3223_v13 }
 0x2cf   :  { %v4016_v34 = vpop.f32.mrf.mxu0  ;;  %v4054_v16 = vpop.f32.mrf.mxu1 }
 0x2d0   :  { %v4017_v36 = vadd.f32 %v4016_v34, %v4015_v22  ;;  %v4055_v44 = vadd.f32 %v4054_v16, %v4053_v33 }
 0x2d2   :  { %v3228_v38 = vadd.f32 %v4017_v36, %v3153_v30 }
 0x2d4   :  { %v3303_v52 = vadd.f32 %v4055_v44, %v3228_v38 }
 0x2eb   :  { %v4088_v25 = vpop.f32.mrf.mxu0  ;;  %v4126_v39 = vpop.f32.mrf.mxu1 }
 0x2ed   :  { %v4089_v20 = vpop.f32.mrf.mxu0  ;;  %v4127_v42 = vpop.f32.mrf.mxu1 }
 0x2ee   :  { %v4090_v23 = vadd.f32 %v4089_v20, %v4088_v25  ;;  %v4128_v47 = vadd.f32 %v4127_v42, %v4126_v39 }
 0x2ef   :  { %v4091_v43 = vpop.f32.mrf.mxu0  ;;  %v4129_v48 = vpop.f32.mrf.mxu1 }
 0x2f0   :  { %v3373_v45 = vadd.f32 %v4090_v23, %v3298_v41 }
 0x2f1   :  { %v4092_v31 = vpop.f32.mrf.mxu0  ;;  %v4130_v35 = vpop.f32.mrf.mxu1 }
 0x2f2   :  { %v3448_v51 = vadd.f32 %v4128_v47, %v3373_v45  ;;  %v4093_v32 = vadd.f32 %v4092_v31, %v4091_v43  ;;  %v4131_v55 = vadd.f32 %v4130_v35, %v4129_v48 }
 0x2f4   :  { %v3463_v53 = vadd.f32 %v3511_v50, %v3448_v51  ;;  %v3378_v54 = vadd.f32 %v4093_v32, %v3303_v52 }
 0x2f6   :  { %3465 = vst [vmem:[%s4657_s7] sm:$0xff] %v3463_v53  ;;  %v3453_v56 = vadd.f32 %v4131_v55, %v3378_v54 }
 0x2f8   :  { %v3464_v58 = vadd.f32 %v3511_v50, %v3453_v56 }
 0x2fa   :  { %3466 = vst [vmem:[%s4657_s7 + $0x8] sm:$0xff] %v3464_v58 }
 0x2fb   :  { %3471 = vsyncpa [#allocation3], 1 }
 0x2fc   :  { %3472 = vsyncpa [#allocation5], 1 }
 0x2fd   :  { %3473 = vsyncpa [#allocation8], 1 }
 0x2fe   :  { %3474 = vsyncpa [#allocation11], 1 }

</bundles_post_ra>
